<compile_context>
chip_gen: v7x
topology: tpu7x:2x2x1
jax: 0.10.0
libtpu: 0.0.40
codegen_flags: <defaults>
</compile_context>

<pallas_src>
import functools
import math

import jax
import jax.numpy as jnp
from jax.experimental import pallas as pl
from jax.experimental.pallas import tpu as pltpu


def propogator_kernel(a_in_bd_ref, a_out_bd_ref, s_in_ref, s_out_ref,
                      s_cur_ref, w_gate_ref, b_gate_ref, w_t_ref, out_ref,
                      *, state_dim):
    D = state_dim
    sc = s_cur_ref[...]                                      # [M, D]  f32

    # One MXU matmul per direction over the block-diagonal adjacency
    # (K = Bt*E*N) instead of Bt tiny batched [N, E*N] @ [E*N, D] matmuls.
    a_in = jnp.dot(a_in_bd_ref[...], s_in_ref[...],
                   preferred_element_type=jnp.float32)       # [M, D]
    a_out = jnp.dot(a_out_bd_ref[...], s_out_ref[...],
                    preferred_element_type=jnp.float32)      # [M, D]

    # Fused gate pre-activations: one [M, 3D] @ [3D, 3D] MXU pass produces the
    # r | z | h(a-part) columns; h's state path is added below via (r*sc) @ W_t
    # (the state rows of the h column block of w_gate are zero).
    x = jnp.concatenate([a_in, a_out, sc], axis=1).astype(jnp.bfloat16)   # [M, 3D]
    gates = jnp.dot(x, w_gate_ref[...],
                    preferred_element_type=jnp.float32) + b_gate_ref[...] # [M, 3D]

    # r|z sigmoid on the packed [M, 2D] block in one shot, sliced afterwards.
    rz = jax.nn.sigmoid(gates[:, :2 * D])
    r = rz[:, :D]
    z = rz[:, D:]

    h_hat = jnp.tanh(
        gates[:, 2 * D:]
        + jnp.dot((r * sc).astype(jnp.bfloat16), w_t_ref[...],
                  preferred_element_type=jnp.float32))
    out_ref[...] = ((1.0 - z) * sc + z * h_hat).astype(out_ref.dtype)


def propogator_forward(state_in, state_out, state_cur, A, params, *,
                       n_node, n_edge_types, state_dim, block_batch=None):
    """Pallas forward of Propogator.forward.

    state_in, state_out : [B, E*N, D]
    state_cur           : [B, N, D]
    A                   : [B, N, 2*E*N]  (in-edge columns | out-edge columns)
    returns             : [B, N, D] float32
    """
    B = state_cur.shape[0]
    N, D, E = n_node, state_dim, n_edge_types
    EN = E * N

    # --- batch blocking: Bt graphs per grid step, M = Bt*N rows per matmul.
    if block_batch is None:
        block_batch = max(1, 256 // N)                    # target M ~ 256
        if B > 1:
            # keep G >= 2 so the "parallel" axis can shard across v7x's 2 TCs
            block_batch = min(block_batch, pl.cdiv(B, 2))
    Bt = max(1, min(block_batch, B))
    G = pl.cdiv(B, Bt)
    B_pad = G * Bt
    M = Bt * N
    K = Bt * EN

    if G > 1:
        # (8,128) rule: blocked second-minor dims must be sublane-aligned.
        assert M % 8 == 0 and K % 8 == 0, "choose block_batch so Bt*N and Bt*E*N are multiples of 8"

    if B_pad != B:
        pad = B_pad - B
        state_in = jnp.pad(state_in, ((0, pad), (0, 0), (0, 0)))
        state_out = jnp.pad(state_out, ((0, pad), (0, 0), (0, 0)))
        state_cur = jnp.pad(state_cur, ((0, pad), (0, 0), (0, 0)))
        A = jnp.pad(A, ((0, pad), (0, 0), (0, 0)))

    bf = jnp.bfloat16
    s_in_flat = state_in.astype(bf).reshape(B_pad * EN, D)
    s_out_flat = state_out.astype(bf).reshape(B_pad * EN, D)
    s_cur_flat = state_cur.astype(jnp.float32).reshape(B_pad * N, D)

    # --- block-diagonalize adjacency over the Bt graphs of each block so the
    # in-kernel aggregation is one [M, Bt*E*N] @ [Bt*E*N, D] matmul / direction.
    eye = jnp.eye(Bt, dtype=bf)

    def block_diag(A_dir):                      # [B_pad, N, EN] -> [B_pad*N, Bt*EN]
        A_r = A_dir.astype(bf).reshape(G, Bt, N, EN)
        bd = A_r[:, :, :, None, :] * eye[None, :, None, :, None]
        return bd.reshape(B_pad * N, K)

    A_in_bd = block_diag(A[:, :, :EN])
    A_out_bd = block_diag(A[:, :, EN:])

    # --- pack the three gate linears into one [3D, 3D] weight; state->h path
    # (applied to r*state_cur) kept as a separate [D, D] weight.
    wr, wz, wt = params["wr"], params["wz"], params["wt"]            # [3D, D]
    W_gate = jnp.concatenate(
        [wr, wz, jnp.concatenate([wt[:2 * D], jnp.zeros((D, D), wt.dtype)], axis=0)],
        axis=1).astype(bf)                                           # [3D, 3D]
    b_gate = jnp.concatenate([params["br"], params["bz"], params["bt"]],
                             axis=1).astype(jnp.float32)             # [1, 3D]
    W_t_state = wt[2 * D:].astype(bf)                                # [D, D]

    kernel = functools.partial(propogator_kernel, state_dim=D)

    def full_spec(arr):
        nd = arr.ndim
        return pl.BlockSpec(arr.shape, lambda g, nd=nd: (0,) * nd)

    out_flat = pl.pallas_call(
        kernel,
        out_shape=jax.ShapeDtypeStruct((B_pad * N, D), jnp.float32),
        grid_spec=pltpu.PrefetchScalarGridSpec(
            num_scalar_prefetch=0,
            grid=(G,),
            in_specs=[
                pl.BlockSpec((M, K), lambda g: (g, 0)),   # A_in  (block-diag)
                pl.BlockSpec((M, K), lambda g: (g, 0)),   # A_out (block-diag)
                pl.BlockSpec((K, D), lambda g: (g, 0)),   # state_in
                pl.BlockSpec((K, D), lambda g: (g, 0)),   # state_out
                pl.BlockSpec((M, D), lambda g: (g, 0)),   # state_cur
                full_spec(W_gate), full_spec(b_gate), full_spec(W_t_state),
            ],
            out_specs=pl.BlockSpec((M, D), lambda g: (g, 0)),
        ),
        compiler_params=pltpu.CompilerParams(
            dimension_semantics=("parallel",)),
    )(A_in_bd, A_out_bd, s_in_flat, s_out_flat, s_cur_flat,
      W_gate, b_gate, W_t_state)

    return out_flat.reshape(B_pad, N, D)[:B]


def propogator_ref(state_in, state_out, state_cur, A, params, *,
                   n_node, n_edge_types):
    """Pure-JAX f32 reference (mirrors the PyTorch Propogator.forward)."""
    EN = n_node * n_edge_types
    A_in, A_out = A[:, :, :EN], A[:, :, EN:]
    a_in = jnp.einsum('bnk,bkd->bnd', A_in, state_in)
    a_out = jnp.einsum('bnk,bkd->bnd', A_out, state_out)
    a = jnp.concatenate([a_in, a_out, state_cur], axis=2)
    r = jax.nn.sigmoid(a @ params["wr"] + params["br"])
    z = jax.nn.sigmoid(a @ params["wz"] + params["bz"])
    joined = jnp.concatenate([a_in, a_out, r * state_cur], axis=2)
    h_hat = jnp.tanh(joined @ params["wt"] + params["bt"])
    return (1.0 - z) * state_cur + z * h_hat


def init_params(key, *, state_dim):
    """Deterministic synthetic init for the three Linear(3D -> D) layers."""
    D = state_dim

    def linear(k, fan_in, fan_out):
        kw, kb = jax.random.split(k)
        std = math.sqrt(2.0 / (fan_in + fan_out))
        W = std * jax.random.normal(kw, (fan_in, fan_out), jnp.float32)
        b = 0.1 * jax.random.normal(kb, (1, fan_out), jnp.float32)
        return W, b

    kr, kz, kt = jax.random.split(key, 3)
    wr, br = linear(kr, 3 * D, D)
    wz, bz = linear(kz, 3 * D, D)
    wt, bt = linear(kt, 3 * D, D)
    return {"wr": wr, "br": br, "wz": wz, "bz": bz, "wt": wt, "bt": bt}


if __name__ == "__main__":
    # small but representative Propogator shapes
    B = 32          # batch of graphs
    N = 8           # n_node
    D = 32          # state_dim
    E = 2           # n_edge_types
    EN = E * N

    key = jax.random.PRNGKey(0)
    k_cur, k_in, k_out, k_adj, k_par = jax.random.split(key, 5)

    state_cur = jax.random.normal(k_cur, (B, N, D), jnp.float32)
    state_in = jax.random.normal(k_in, (B, EN, D), jnp.float32)
    state_out = jax.random.normal(k_out, (B, EN, D), jnp.float32)
    A = (jax.random.uniform(k_adj, (B, N, 2 * EN)) > 0.7).astype(jnp.float32)

    params = init_params(k_par, state_dim=D)

    out = propogator_forward(state_in, state_out, state_cur, A, params,
                             n_node=N, n_edge_types=E, state_dim=D)
    out = jax.block_until_ready(out)

    ref = propogator_ref(state_in, state_out, state_cur, A, params,
                         n_node=N, n_edge_types=E)

    assert out.shape == (B, N, D)
    assert bool(jnp.all(jnp.isfinite(out)))
    # bf16 MXU operands drift slightly from the pure-f32 reference; output is a
    # GRU-style convex blend of O(1) values, so a 0.1 absolute bound is a
    # meaningful (and safe) parity check.
    max_err = float(jnp.max(jnp.abs(out - ref)))
    assert max_err < 0.1, f"max abs err vs f32 reference: {max_err}"
    print("KERNEL_OK")
</pallas_src>

<mosaic_0001>
module attributes {stable_mosaic.version = 11 : i64} {
  func.func @propogator_kernel(%arg0: i32, %arg1: memref<128x256xbf16, #tpu.memory_space<vmem>>, %arg2: memref<128x256xbf16, #tpu.memory_space<vmem>>, %arg3: memref<256x32xbf16, #tpu.memory_space<vmem>>, %arg4: memref<256x32xbf16, #tpu.memory_space<vmem>>, %arg5: memref<128x32xf32, #tpu.memory_space<vmem>>, %arg6: memref<96x96xbf16, #tpu.memory_space<vmem>>, %arg7: memref<1x96xf32, #tpu.memory_space<vmem>>, %arg8: memref<32x32xbf16, #tpu.memory_space<vmem>>, %arg9: memref<128x32xf32, #tpu.memory_space<vmem>>) attributes {dimension_semantics = [#tpu.dimension_semantics<parallel>], iteration_bounds = array<i64: 2>, scalar_prefetch = 0 : i64, scratch_operands = 0 : i64, tpu.core_type = #tpu.core_type<tc>, window_params = [{transform_indices = @transform_0, window_bounds = array<i64: 128, 256>}, {transform_indices = @transform_1, window_bounds = array<i64: 128, 256>}, {transform_indices = @transform_2, window_bounds = array<i64: 256, 32>}, {transform_indices = @transform_3, window_bounds = array<i64: 256, 32>}, {transform_indices = @transform_4, window_bounds = array<i64: 128, 32>}, {pipeline_mode = #tpu.pipeline_mode<synchronous>, transform_indices = @transform_5, window_bounds = array<i64: 96, 96>}, {pipeline_mode = #tpu.pipeline_mode<synchronous>, transform_indices = @transform_6, window_bounds = array<i64: 1, 96>}, {pipeline_mode = #tpu.pipeline_mode<synchronous>, transform_indices = @transform_7, window_bounds = array<i64: 32, 32>}, {transform_indices = @transform_8, window_bounds = array<i64: 128, 32>}]} {
    %c0 = arith.constant 0 : index
    %c0_0 = arith.constant 0 : index
    %0 = vector.load %arg5[%c0, %c0_0] : memref<128x32xf32, #tpu.memory_space<vmem>>, vector<128x32xf32>
    %c0_1 = arith.constant 0 : index
    %c0_2 = arith.constant 0 : index
    %1 = vector.load %arg1[%c0_1, %c0_2] : memref<128x256xbf16, #tpu.memory_space<vmem>>, vector<128x256xbf16>
    %c0_3 = arith.constant 0 : index
    %c0_4 = arith.constant 0 : index
    %2 = vector.load %arg3[%c0_3, %c0_4] : memref<256x32xbf16, #tpu.memory_space<vmem>>, vector<256x32xbf16>
    %cst = arith.constant dense<0.000000e+00> : vector<128x32xf32>
    %3 = tpu.matmul %1, %2, %cst {dimension_numbers = #tpu.dot_dimension_numbers<[1], [0], [0], [1], [0, 0, 1, 1], [], []>} : vector<128x256xbf16>, vector<256x32xbf16>, vector<128x32xf32> -> vector<128x32xf32>
    %c0_5 = arith.constant 0 : index
    %c0_6 = arith.constant 0 : index
    %4 = vector.load %arg2[%c0_5, %c0_6] : memref<128x256xbf16, #tpu.memory_space<vmem>>, vector<128x256xbf16>
    %c0_7 = arith.constant 0 : index
    %c0_8 = arith.constant 0 : index
    %5 = vector.load %arg4[%c0_7, %c0_8] : memref<256x32xbf16, #tpu.memory_space<vmem>>, vector<256x32xbf16>
    %cst_9 = arith.constant dense<0.000000e+00> : vector<128x32xf32>
    %6 = tpu.matmul %4, %5, %cst_9 {dimension_numbers = #tpu.dot_dimension_numbers<[1], [0], [0], [1], [0, 0, 1, 1], [], []>} : vector<128x256xbf16>, vector<256x32xbf16>, vector<128x32xf32> -> vector<128x32xf32>
    %7 = tpu.concatenate %3, %6, %0 in 1 : vector<128x32xf32>, vector<128x32xf32>, vector<128x32xf32> -> vector<128x96xf32>
    %8 = arith.truncf %7 : vector<128x96xf32> to vector<128x96xbf16>
    %c0_10 = arith.constant 0 : index
    %c0_11 = arith.constant 0 : index
    %9 = vector.load %arg6[%c0_10, %c0_11] : memref<96x96xbf16, #tpu.memory_space<vmem>>, vector<96x96xbf16>
    %cst_12 = arith.constant dense<0.000000e+00> : vector<128x96xf32>
    %10 = tpu.matmul %8, %9, %cst_12 {dimension_numbers = #tpu.dot_dimension_numbers<[1], [0], [0], [1], [0, 0, 1, 1], [], []>} : vector<128x96xbf16>, vector<96x96xbf16>, vector<128x96xf32> -> vector<128x96xf32>
    %c0_13 = arith.constant 0 : index
    %c0_14 = arith.constant 0 : index
    %11 = vector.load %arg7[%c0_13, %c0_14] : memref<1x96xf32, #tpu.memory_space<vmem>>, vector<1x96xf32>
    %12 = vector.broadcast %11 : vector<1x96xf32> to vector<128x96xf32>
    %13 = arith.addf %10, %12 : vector<128x96xf32>
    %14 = vector.extract_strided_slice %13 {offsets = [0, 0], sizes = [128, 64], strides = [1, 1]} : vector<128x96xf32> to vector<128x64xf32>
    %15 = arith.negf %14 : vector<128x64xf32>
    %16 = math.exp %15 : vector<128x64xf32>
    %cst_15 = arith.constant 1.000000e+00 : f32
    %17 = vector.broadcast %cst_15 : f32 to vector<128x64xf32>
    %18 = arith.addf %17, %16 : vector<128x64xf32>
    %19 = arith.divf %17, %18 : vector<128x64xf32>
    %20 = vector.extract_strided_slice %19 {offsets = [0, 0], sizes = [128, 32], strides = [1, 1]} : vector<128x64xf32> to vector<128x32xf32>
    %21 = vector.extract_strided_slice %19 {offsets = [0, 32], sizes = [128, 32], strides = [1, 1]} : vector<128x64xf32> to vector<128x32xf32>
    %22 = vector.extract_strided_slice %13 {offsets = [0, 64], sizes = [128, 32], strides = [1, 1]} : vector<128x96xf32> to vector<128x32xf32>
    %23 = arith.mulf %20, %0 : vector<128x32xf32>
    %24 = arith.truncf %23 : vector<128x32xf32> to vector<128x32xbf16>
    %c0_16 = arith.constant 0 : index
    %c0_17 = arith.constant 0 : index
    %25 = vector.load %arg8[%c0_16, %c0_17] : memref<32x32xbf16, #tpu.memory_space<vmem>>, vector<32x32xbf16>
    %cst_18 = arith.constant dense<0.000000e+00> : vector<128x32xf32>
    %26 = tpu.matmul %24, %25, %cst_18 {dimension_numbers = #tpu.dot_dimension_numbers<[1], [0], [0], [1], [0, 0, 1, 1], [], []>} : vector<128x32xbf16>, vector<32x32xbf16>, vector<128x32xf32> -> vector<128x32xf32>
    %27 = arith.addf %22, %26 : vector<128x32xf32>
    %28 = math.tanh %27 : vector<128x32xf32>
    %cst_19 = arith.constant 1.000000e+00 : f32
    %29 = vector.broadcast %cst_19 : f32 to vector<128x32xf32>
    %30 = arith.subf %29, %21 : vector<128x32xf32>
    %31 = arith.mulf %30, %0 : vector<128x32xf32>
    %32 = arith.mulf %21, %28 : vector<128x32xf32>
    %33 = arith.addf %31, %32 : vector<128x32xf32>
    %c0_20 = arith.constant 0 : index
    %c0_21 = arith.constant 0 : index
    %34 = vector.load %arg9[%c0_20, %c0_21] : memref<128x32xf32, #tpu.memory_space<vmem>>, vector<128x32xf32>
    tpu.vector_store %arg9[%c0_20, %c0_21], %33 {strides = array<i32>} : memref<128x32xf32, #tpu.memory_space<vmem>>, vector<128x32xf32>,
    return
  }
  func.func @transform_0(%arg0: i32) -> (i32, i32) {
    %c0_i32 = arith.constant 0 : i32
    %c0_i32_0 = arith.constant 0 : i32
    return %arg0, %c0_i32 : i32, i32
  }
  func.func @transform_1(%arg0: i32) -> (i32, i32) {
    %c0_i32 = arith.constant 0 : i32
    %c0_i32_0 = arith.constant 0 : i32
    return %arg0, %c0_i32 : i32, i32
  }
  func.func @transform_2(%arg0: i32) -> (i32, i32) {
    %c0_i32 = arith.constant 0 : i32
    %c0_i32_0 = arith.constant 0 : i32
    return %arg0, %c0_i32 : i32, i32
  }
  func.func @transform_3(%arg0: i32) -> (i32, i32) {
    %c0_i32 = arith.constant 0 : i32
    %c0_i32_0 = arith.constant 0 : i32
    return %arg0, %c0_i32 : i32, i32
  }
  func.func @transform_4(%arg0: i32) -> (i32, i32) {
    %c0_i32 = arith.constant 0 : i32
    %c0_i32_0 = arith.constant 0 : i32
    return %arg0, %c0_i32 : i32, i32
  }
  func.func @transform_5(%arg0: i32) -> (i32, i32) {
    %c0_i32 = arith.constant 0 : i32
    %c0_i32_0 = arith.constant 0 : i32
    %c0_i32_1 = arith.constant 0 : i32
    return %c0_i32, %c0_i32_0 : i32, i32
  }
  func.func @transform_6(%arg0: i32) -> (i32, i32) {
    %c0_i32 = arith.constant 0 : i32
    %c0_i32_0 = arith.constant 0 : i32
    %c0_i32_1 = arith.constant 0 : i32
    return %c0_i32, %c0_i32_0 : i32, i32
  }
  func.func @transform_7(%arg0: i32) -> (i32, i32) {
    %c0_i32 = arith.constant 0 : i32
    %c0_i32_0 = arith.constant 0 : i32
    %c0_i32_1 = arith.constant 0 : i32
    return %c0_i32, %c0_i32_0 : i32, i32
  }
  func.func @transform_8(%arg0: i32) -> (i32, i32) {
    %c0_i32 = arith.constant 0 : i32
    %c0_i32_0 = arith.constant 0 : i32
    return %arg0, %c0_i32 : i32, i32
  }
}

</mosaic_0001>

<bundles_post_ra>
// kernel: tpu_custom_call.1
= control target key start
LH: loop header
LB: loop body
LE: loop exit
PB: predicated region body
PF: predicated region fallthrough
CT: control target
= control target key end

     0   :  { %s2781_s27 = smov 0   ;;  %s3410_s0 = inlined_call_operand.vmem [shape: bf16[256,256], index: 0, kind: input, shape index: {}]   ;;  %s3411_s1 = inlined_call_operand.vmem [shape: bf16[256,256], index: 1, kind: input, shape index: {}]   ;;  %s3412_s2 = inlined_call_operand.vmem [shape: bf16[512,32], index: 2, kind: input, shape index: {}]   ;;  %s3413_s3 = inlined_call_operand.vmem [shape: bf16[512,32], index: 3, kind: input, shape index: {}]   ;;  %s3414_s4 = inlined_call_operand.vmem [shape: f32[256,32], index: 4, kind: input, shape index: {}]   ;;  %s3415_s5 = inlined_call_operand.vmem [shape: bf16[96,96], index: 5, kind: input, shape index: {}]   ;;  %s3416_s6 = inlined_call_operand.vmem [shape: f32[1,96], index: 6, kind: input, shape index: {}]   ;;  %s3417_s7 = inlined_call_operand.vmem [shape: bf16[32,32], index: 7, kind: input, shape index: {}]   ;;  %s3418_s8 = inlined_call_operand.vmem [shape: f32[256,32], index: 8, kind: output, shape index: {}]  }
   0x1 LB: > { %s2122_s28 = sadd.s32 4294967295, %s2731_s27   ;;  %p2126_p0 = scmp.ge.s32.totalorder %s2731_s27, 1  ;;  %s2731_s27 = sphi %s2781_s27, %s18_s27  }
   0x2   : > { %p309_p1 = scmp.lt.s32.totalorder %s2731_s27, 3 }
   0x4   : > { %p310_p2 = pnand %p2126_p0, %p309_p1 }
   0x5   : > { %s2133_s29 = sshll.u32 (!%p310_p2), %s2122_s28, 5  ;;  %s2127_s12 = sshll.u32 (!%p310_p2), %s2122_s28, 4  ;;  %vm1190_vm0 = vcmask (!%p310_p2), 261120   ;;  %vm1207_vm1 = vcmask (!%p310_p2), 523264   ;;  %vm1287_vm2 = vcmask (!%p310_p2), 785408  }
   0x6   : > { %313 = sbr.rel (%p310_p2) target bundleno = 1280 (0x500), region = 52  ;;  %p380_p3 = scmp.lt.s32.totalorder (!%p310_p2), %s2133_s29, 63 }
   0x7   : > { %p366_p4 = scmp.lt.s32.totalorder (!%p310_p2), %s2127_s12, 31  ;;  %s2733_s26 = smov (!%p310_p2), 64  }
   0xd   : > { %s3420_s29 = smov (!%p380_p3, %s2133_s29), 63  ;;  %s3422_s12 = smov (!%p366_p4, %s2127_s12), 31 }
   0xe   : > { %s2134_s30 = sshll.u32 %s3420_s29, 2  ;;  %s2807_s13 = sshll.u32 %s3422_s12, 3 }
   0xf   : > { %s2797_s11 = scalar_lea.vmem %s3413_s3, %s2134_s30  ;;  %s2814_s16 = scalar_lea.vmem %s3411_s1, %s2807_s13 }
  0x10   : > { %v2541_v0 = vld [vmem:[%s2797_s11 + $0x40] sm:$0xff]   ;;  %v2543_v2 = vld [vmem:[%s2797_s11 + $0x48] sm:$0xff]   ;;  %v2545_v4 = vld [vmem:[%s2797_s11 + $0x50] sm:$0xff]   ;;  %s2828_s19 = scalar_lea.vmem %s3412_s2, %s2134_s30  ;;  %s2848_s22 = scalar_lea.vmem %s3410_s0, %s2807_s13 }
  0x11   : > { %v2542_v1 = vld [vmem:[%s2797_s11] sm:$0xff]   ;;  %2314 = vmatprep.subr.bf16.mxu1 %v2541_v0  ;;  %v2544_v3 = vld [vmem:[%s2797_s11 + $0x8] sm:$0xff]   ;;  %v2546_v5 = vld [vmem:[%s2797_s11 + $0x10] sm:$0xff]   ;;  %s2888_s25 = scalar_lea.vmem %s3414_s4, %s2807_s13  ;;  %s3373_s30 = scalar_lea.vmem %s3418_s8, %s2807_s13 }
  0x12   : > { %2315 = vmatpush3.bf16.msra.mxu1 %v2542_v1  ;;  %v2547_v6 = vld [vmem:[%s2797_s11 + $0x58] sm:$0xff]   ;;  %v2549_v8 = vld [vmem:[%s2797_s11 + $0x60] sm:$0xff]   ;;  %v2551_v10 = vld [vmem:[%s2797_s11 + $0x68] sm:$0xff]  }
  0x13   : > { %2316 = vmatprep.subr.bf16.mxu1 %v2543_v2  ;;  %v2548_v7 = vld [vmem:[%s2797_s11 + $0x18] sm:$0xff]   ;;  %v2550_v9 = vld [vmem:[%s2797_s11 + $0x20] sm:$0xff]   ;;  %v2552_v12 = vld [vmem:[%s2797_s11 + $0x28] sm:$0xff]  }
  0x14   : > { %v2559_v11 = vld [vmem:[%s2814_s16 + $0x4] ss:$8 sps:$4 sm:$0xff]   ;;  %v2553_v13 = vld [vmem:[%s2797_s11 + $0x70] sm:$0xff]   ;;  %v2555_v15 = vld [vmem:[%s2797_s11 + $0x78] sm:$0xff]  }
  0x15   : > { %997 = vmatprep.mubr.bf16.mxu1 %v2559_v11  ;;  %v2554_v14 = vld [vmem:[%s2797_s11 + $0x30] sm:$0xff]   ;;  %v2556_v16 = vld [vmem:[%s2797_s11 + $0x38] sm:$0xff]   ;;  %v2581_v17 = vld [vmem:[%s2828_s19 + $0x40] sm:$0xff]  }
  0x16   : > { %2317 = vmatpush3.bf16.msra.mxu1 %v2544_v3  ;;  %v2557_v18 = vld [vmem:[%s2814_s16] ss:$8 sps:$4 sm:$0xff]   ;;  %v2560_v20 = vld [vmem:[%s2814_s16 + $0x14] ss:$8 sps:$4 sm:$0xff]   ;;  %2250 = vmatprep.subr.bf16.mxu0 %v2581_v17  ;;  %v2562_v26 = vld [vmem:[%s2814_s16 + $0x10] ss:$8 sps:$4 sm:$0xff]  }
  0x17   : > { %2318 = vmatprep.subr.bf16.mxu1 %v2545_v4  ;;  %v2582_v19 = vld [vmem:[%s2828_s19] sm:$0xff]   ;;  %v2583_v21 = vld [vmem:[%s2828_s19 + $0x48] sm:$0xff]   ;;  %v2585_v23 = vld [vmem:[%s2828_s19 + $0x50] sm:$0xff]  }
  0x18   : > { %2251 = vmatpush3.bf16.msra.mxu0 %v2582_v19  ;;  %v2584_v22 = vld [vmem:[%s2828_s19 + $0x8] sm:$0xff]   ;;  %v2586_v24 = vld [vmem:[%s2828_s19 + $0x10] sm:$0xff]   ;;  %v2587_v25 = vld [vmem:[%s2828_s19 + $0x58] sm:$0xff]  }
  0x19   : > { %2252 = vmatprep.subr.bf16.mxu0 %v2583_v21  ;;  %v2563_v27 = vld [vmem:[%s2814_s16 + $0x24] ss:$8 sps:$4 sm:$0xff]   ;;  %v2588_v28 = vld [vmem:[%s2828_s19 + $0x18] sm:$0xff]   ;;  %v2565_v33 = vld [vmem:[%s2814_s16 + $0x20] ss:$8 sps:$4 sm:$0xff]  }
  0x1a   : > { %2319 = vmatpush3.bf16.msra.mxu1 %v2546_v5  ;;  %v2589_v29 = vld [vmem:[%s2828_s19 + $0x60] sm:$0xff]   ;;  %v2591_v31 = vld [vmem:[%s2828_s19 + $0x68] sm:$0xff]   ;;  %v2566_v35 = vld [vmem:[%s2814_s16 + $0x34] ss:$8 sps:$4 sm:$0xff]  }
  0x1b   : > { %2320 = vmatprep.subr.bf16.mxu1 %v2547_v6  ;;  %v2590_v30 = vld [vmem:[%s2828_s19 + $0x20] sm:$0xff]   ;;  %v2592_v34 = vld [vmem:[%s2828_s19 + $0x28] sm:$0xff]   ;;  %v2593_v36 = vld [vmem:[%s2828_s19 + $0x70] sm:$0xff]  }
  0x1c   : > { %2253 = vmatpush3.bf16.msra.mxu0 %v2584_v22  ;;  %v2599_v32 = vld [vmem:[%s2848_s22 + $0x4] ss:$8 sps:$4 sm:$0xff]   ;;  %v2594_v37 = vld [vmem:[%s2828_s19 + $0x30] sm:$0xff]   ;;  %v2595_v38 = vld [vmem:[%s2828_s19 + $0x78] sm:$0xff]  }
  0x1d   : > { %2254 = vmatprep.subr.bf16.mxu0 %v2585_v23  ;;  %676 = vmatprep.mubr.bf16.mxu0 %v2599_v32  ;;  %v2568_v39 = vld [vmem:[%s2814_s16 + $0x30] ss:$8 sps:$4 sm:$0xff]   ;;  %v2569_v41 = vld [vmem:[%s2814_s16 + $0x44] ss:$8 sps:$4 sm:$0xff]   ;;  %v2597_v42 = vld [vmem:[%s2848_s22] ss:$8 sps:$4 sm:$0xff]  }
  0x1e   : > { %2321 = vmatpush3.bf16.msra.mxu1 %v2548_v7  ;;  %v2596_v40 = vld [vmem:[%s2828_s19 + $0x38] sm:$0xff]   ;;  %v2571_v44 = vld [vmem:[%s2814_s16 + $0x40] ss:$8 sps:$4 sm:$0xff]   ;;  %v2603_v47 = vld [vmem:[%s2848_s22 + $0x24] ss:$8 sps:$4 sm:$0xff]   ;;  %s2734_s19 = smov 32  }
  0x1f   : > { %2322 = vmatprep.subr.bf16.mxu1 %v2549_v8  ;;  %v2600_v43 = vld [vmem:[%s2848_s22 + $0x14] ss:$8 sps:$4 sm:$0xff]   ;;  %v2602_v46 = vld [vmem:[%s2848_s22 + $0x10] ss:$8 sps:$4 sm:$0xff]   ;;  %v2575_v49 = vld [vmem:[%s2814_s16 + $0x64] ss:$8 sps:$4 sm:$0xff]  }
  0x20   : > { %2255 = vmatpush3.bf16.msra.mxu0 %v2586_v24  ;;  %v2572_v45 = vld [vmem:[%s2814_s16 + $0x54] ss:$8 sps:$4 sm:$0xff]   ;;  %v2574_v48 = vld [vmem:[%s2814_s16 + $0x50] ss:$8 sps:$4 sm:$0xff]   ;;  %v2605_v50 = vld [vmem:[%s2848_s22 + $0x20] ss:$8 sps:$4 sm:$0xff]  }
  0x21   : > { %2256 = vmatprep.subr.bf16.mxu0 %v2587_v25  ;;  %v2606_v51 = vld [vmem:[%s2848_s22 + $0x34] ss:$8 sps:$4 sm:$0xff]   ;;  %v2577_v52 = vld [vmem:[%s2814_s16 + $0x60] ss:$8 sps:$4 sm:$0xff]   ;;  %v2608_v54 = vld [vmem:[%s2848_s22 + $0x30] ss:$8 sps:$4 sm:$0xff]  }
  0x22   : > { %2323 = vmatpush3.bf16.msra.mxu1 %v2550_v9  ;;  %v2578_v53 = vld [vmem:[%s2814_s16 + $0x74] ss:$8 sps:$4 sm:$0xff]   ;;  %v2609_v55 = vld [vmem:[%s2848_s22 + $0x44] ss:$8 sps:$4 sm:$0xff]   ;;  %v2580_v56 = vld [vmem:[%s2814_s16 + $0x70] ss:$8 sps:$4 sm:$0xff]  }
  0x23   : > { %2324 = vmatprep.subr.bf16.mxu1 %v2551_v10  ;;  %v2611_v57 = vld [vmem:[%s2848_s22 + $0x40] ss:$8 sps:$4 sm:$0xff]   ;;  %v2612_v58 = vld [vmem:[%s2848_s22 + $0x54] ss:$8 sps:$4 sm:$0xff]   ;;  %v2614_v59 = vld [vmem:[%s2848_s22 + $0x50] ss:$8 sps:$4 sm:$0xff]  }
  0x24   : > { %2257 = vmatpush3.bf16.msra.mxu0 %v2588_v28  ;;  %v2615_v60 = vld [vmem:[%s2848_s22 + $0x64] ss:$8 sps:$4 sm:$0xff]   ;;  %v2617_v61 = vld [vmem:[%s2848_s22 + $0x60] ss:$8 sps:$4 sm:$0xff]   ;;  %v2618_v62 = vld [vmem:[%s2848_s22 + $0x74] ss:$8 sps:$4 sm:$0xff]  }
  0x25   : > { %2258 = vmatprep.subr.bf16.mxu0 %v2589_v29  ;;  %v2620_v63 = vld [vmem:[%s2848_s22 + $0x70] ss:$8 sps:$4 sm:$0xff]   ;;  %v2891_v0 = vld [vmem:[%s2888_s25] sm:$0xff]  ;;  %v2894_v1 = vld [vmem:[%s2888_s25 + $0x8] sm:$0xff] }
  0x26   : > { %2325 = vmatpush3.bf16.msra.mxu1 %v2552_v12  ;;  %v2461_v2 = vpack.i.bf16 %v2894_v1, %v2891_v0  ;;  %v2900_v3 = vld [vmem:[%s2888_s25 + $0x10] sm:$0xff]  ;;  %v2903_v4 = vld [vmem:[%s2888_s25 + $0x18] sm:$0xff]  ;;  %v2621_v6 = vld [vmem:[%s3415_s5] sm:$0xff]  }
  0x27   : > { %2326 = vmatprep.subr.bf16.mxu1 %v2553_v13  ;;  %v2466_v5 = vpack.i.bf16 %v2903_v4, %v2900_v3  ;;  %v2622_v7 = vld [vmem:[%s3415_s5 + $0x8] sm:$0xff]   ;;  %v2623_v8 = vld [vmem:[%s3415_s5 + $0x10] sm:$0xff]   ;;  %v2624_v9 = vld [vmem:[%s3415_s5 + $0x18] sm:$0xff]  }
  0x28   : > { %2259 = vmatpush3.bf16.msra.mxu0 %v2590_v30  ;;  %2462 = vrot.lane.b32.xlu1 %v2461_v2, %s2733_s26  ;;  %v2625_v10 = vld [vmem:[%s3415_s5 + $0x20] sm:$0xff]  }
  0x29   : > { %2260 = vmatprep.subr.bf16.mxu0 %v2591_v31  ;;  %v2929_v32 = vld [vmem:[%s2888_s25 + $0x20] sm:$0xff] }
  0x2a   : > { %2327 = vmatpush3.bf16.msra.mxu1 %v2554_v14 }
  0x2b   : > { %2328 = vmatprep.subr.bf16.mxu1 %v2555_v15 }
  0x2c   : > { %2261 = vmatpush3.bf16.msra.mxu0 %v2592_v34  ;;  %2467 = vrot.lane.b32.xlu1 %v2466_v5, %s2733_s26 }
  0x2d   : > { %2262 = vmatprep.subr.bf16.mxu0 %v2593_v36 }
  0x2e   : > { %2329 = vmatpush3.bf16.msra.mxu1 %v2556_v16  ;;  %v2626_v16 = vld [vmem:[%s3415_s5 + $0x28] sm:$0xff]  }
  0x30   : > { %2263 = vmatpush3.bf16.msra.mxu0 %v2594_v37 }
  0x31   : > { %998 = vmatmul.mubr.bf16.vlgmr.msra.gmra.mrb[0].mxu1 %v2557_v18  ;;  %2264 = vmatprep.subr.bf16.mxu0 %v2595_v38 }
  0x32   : > { %1005 = vmatprep.mubr.bf16.mxu1 %v2560_v20 }
  0x34   : > { %2265 = vmatpush3.bf16.msra.mxu0 %v2596_v40 }
  0x35   : > { %2402 = vmatprep.subr.bf16.mxu0 %v2621_v6 }
  0x37   : > { %677 = vmatmul.mubr.bf16.vlgmr.msra.gmra.mrb[0].mxu0 %v2597_v42 }
  0x38   : > { %684 = vmatprep.mubr.bf16.mxu0 %v2600_v43  ;;  %2403 = vmatpush3.bf16.msra.mxu0 %v2621_v6 }
  0x39   : > { %1006 = vmatmul.mubr.bf16.gmra.mrb[4].mxu1 %v2562_v26  ;;  %2404 = vmatprep.subr.bf16.mxu0 %v2622_v7 }
  0x3a   : > { %1013 = vmatprep.mubr.bf16.mxu1 %v2563_v27 }
  0x3c   : > { %2405 = vmatpush3.bf16.msra.mxu0 %v2622_v7 }
  0x3d   : > { %2406 = vmatprep.subr.bf16.mxu0 %v2623_v8 }
  0x3f   : > { %685 = vmatmul.mubr.bf16.gmra.mrb[4].mxu0 %v2602_v46 }
  0x40   : > { %692 = vmatprep.mubr.bf16.mxu0 %v2603_v47  ;;  %2407 = vmatpush3.bf16.msra.mxu0 %v2623_v8 }
  0x41   : > { %1014 = vmatmul.mubr.bf16.gmra.mrb[8].mxu1 %v2565_v33  ;;  %2408 = vmatprep.subr.bf16.mxu0 %v2624_v9  ;;  %v2932_v33 = vld [vmem:[%s2888_s25 + $0x28] sm:$0xff] }
  0x42   : > { %1021 = vmatprep.mubr.bf16.mxu1 %v2566_v35  ;;  %v2486_v36 = vpack.i.bf16 %v2932_v33, %v2929_v32 }
  0x44   : > { %2409 = vmatpush3.bf16.msra.mxu0 %v2624_v9 }
  0x45   : > { %2410 = vmatprep.subr.bf16.mxu0 %v2625_v10 }
  0x47   : > { %693 = vmatmul.mubr.bf16.gmra.mrb[8].mxu0 %v2605_v50 }
  0x48   : > { %700 = vmatprep.mubr.bf16.mxu0 %v2606_v51  ;;  %2411 = vmatpush3.bf16.msra.mxu0 %v2625_v10 }
  0x49   : > { %1022 = vmatmul.mubr.bf16.gmra.mrb[12].mxu1 %v2568_v39  ;;  %2412 = vmatprep.subr.bf16.mxu0 %v2626_v16 }
  0x4a   : > { %1029 = vmatprep.mubr.bf16.mxu1 %v2569_v41 }
  0x4c   : > { %2413 = vmatpush3.bf16.msra.mxu0 %v2626_v16  ;;  %v2967_v16 = vld [vmem:[%s2888_s25 + $0x50] sm:$0xff] }
  0x4f   : > { %701 = vmatmul.mubr.bf16.gmra.mrb[12].mxu0 %v2608_v54 }
  0x50   : > { %708 = vmatprep.mubr.bf16.mxu0 %v2609_v55 }
  0x51   : > { %1030 = vmatmul.mubr.bf16.gmra.mrb[16].mxu1 %v2571_v44  ;;  %v2939_v44 = vld [vmem:[%s2888_s25 + $0x30] sm:$0xff] }
  0x52   : > { %1037 = vmatprep.mubr.bf16.mxu1 %v2572_v45  ;;  %v2942_v45 = vld [vmem:[%s2888_s25 + $0x38] sm:$0xff] }
  0x57   : > { %709 = vmatmul.mubr.bf16.gmra.mrb[16].mxu0 %v2611_v57 }
  0x58   : > { %716 = vmatprep.mubr.bf16.mxu0 %v2612_v58 }
  0x59   : > { %1038 = vmatmul.mubr.bf16.gmra.mrb[20].mxu1 %v2574_v48 }
  0x5a   : > { %1045 = vmatprep.mubr.bf16.mxu1 %v2575_v49 }
  0x5f   : > { %717 = vmatmul.mubr.bf16.gmra.mrb[20].mxu0 %v2614_v59 }
  0x60   : > { %724 = vmatprep.mubr.bf16.mxu0 %v2615_v60  ;;  %v2953_v60 = vld [vmem:[%s2888_s25 + $0x40] sm:$0xff] }
  0x61   : > { %1046 = vmatmul.mubr.bf16.gmra.mrb[24].mxu1 %v2577_v52  ;;  %v2496_v52 = vpack.i.bf16 %v2942_v45, %v2939_v44 }
  0x62   : > { %1053 = vmatprep.mubr.bf16.mxu1 %v2578_v53 }
  0x67   : > { %725 = vmatmul.mubr.bf16.gmra.mrb[24].mxu0 %v2617_v61  ;;  %v2956_v61 = vld [vmem:[%s2888_s25 + $0x48] sm:$0xff] }
  0x68   : > { %732 = vmatprep.mubr.bf16.mxu0 %v2618_v62  ;;  %v2506_v8 = vpack.i.bf16 %v2956_v61, %v2953_v60 }
  0x69   : > { %1054 = vmatmul.mubr.bf16.gmra.mrb[28].mxu1 %v2580_v56 }
  0x6f   : > { %733 = vmatmul.mubr.bf16.gmra.mrb[28].mxu0 %v2620_v63 }
 0x104   : > { %v2330_v11 = vpop.f32.mrb[0].mxu1 }
 0x105   : > { %v2331_v12 = vpop.f32.mrb[1].mxu1 }
 0x106   : > { %v2332_v13 = vadd.f32 %v2331_v12, %v2330_v11  ;;  %v2333_v14 = vpop.f32.mrb[2].mxu1 }
 0x107   : > { %v2334_v15 = vpop.f32.mrb[3].mxu1 }
 0x108   : > { %v2335_v17 = vadd.f32 %v2334_v15, %v2333_v14 }
 0x10a   : > { %v2471_v18 = vpack.i.bf16 %v2335_v17, %v2332_v13  ;;  %v2266_v41 = vpop.f32.mrb[0].mxu0  ;;  %v2970_v17 = vld [vmem:[%s2888_s25 + $0x58] sm:$0xff] }
 0x10b   : > { %v2267_v43 = vpop.f32.mrb[1].mxu0 }
 0x10c   : > { %v2336_v19 = vpop.f32.mrb[4].mxu1  ;;  %2472 = vrot.lane.b32.xlu0 %v2471_v18, %s2734_s19  ;;  %v2944_v46 = vadd.f32 %v2267_v43, %v2266_v41  ;;  %v2269_v47 = vpop.f32.mrb[2].mxu0 }
 0x10d   : > { %v2337_v20 = vpop.f32.mrb[5].mxu1  ;;  %v2270_v49 = vpop.f32.mrb[3].mxu0 }
 0x10e   : > { %v2338_v21 = vadd.f32 %v2337_v20, %v2336_v19  ;;  %v2339_v22 = vpop.f32.mrb[6].mxu1  ;;  %v2946_v50 = vadd.f32 %v2270_v49, %v2269_v47 }
 0x10f   : > { %v2340_v23 = vpop.f32.mrb[7].mxu1 }
 0x110   : > { %v2341_v24 = vadd.f32 %v2340_v23, %v2339_v22 }
 0x112   : > { %v2476_v25 = vpack.i.bf16 %v2341_v24, %v2338_v21  ;;  %v2272_v57 = vpop.f32.mrb[4].mxu0  ;;  %v2516_v24 = vpack.i.bf16 %v2970_v17, %v2967_v16 }
 0x113   : > { %v2273_v59 = vpop.f32.mrb[5].mxu0 }
 0x114   : > { %v2342_v26 = vpop.f32.mrb[8].mxu1  ;;  %2477 = vrot.lane.b32.xlu0 %v2476_v25, %s2734_s19  ;;  %v2958_v62 = vadd.f32 %v2273_v59, %v2272_v57  ;;  %v2275_v63 = vpop.f32.mrb[6].mxu0 }
 0x115   : > { %v2343_v27 = vpop.f32.mrb[9].mxu1  ;;  %v2276_v5 = vpop.f32.mrb[7].mxu0 }
 0x116   : > { %v2344_v28 = vadd.f32 %v2343_v27, %v2342_v26  ;;  %v2345_v29 = vpop.f32.mrb[10].mxu1  ;;  %v2960_v6 = vadd.f32 %v2276_v5, %v2275_v63 }
 0x117   : > { %v2346_v30 = vpop.f32.mrb[11].mxu1 }
 0x118   : > { %v2347_v31 = vadd.f32 %v2346_v30, %v2345_v29 }
 0x11a   : > { %v2481_v34 = vpack.i.bf16 %v2347_v31, %v2344_v28  ;;  %v2278_v13 = vpop.f32.mrb[8].mxu0 }
 0x11b   : > { %v2279_v15 = vpop.f32.mrb[9].mxu0 }
 0x11c   : > { %v2348_v35 = vpop.f32.mrb[12].mxu1  ;;  %2482 = vrot.lane.b32.xlu0 %v2481_v34, %s2734_s19  ;;  %v2972_v18 = vadd.f32 %v2279_v15, %v2278_v13  ;;  %v2281_v19 = vpop.f32.mrb[10].mxu0  ;;  %v2981_v34 = vld [vmem:[%s2888_s25 + $0x60] sm:$0xff] }
 0x11d   : > { %v2349_v37 = vpop.f32.mrb[13].mxu1  ;;  %v2282_v21 = vpop.f32.mrb[11].mxu0 }
 0x11e   : > { %v2350_v38 = vadd.f32 %v2349_v37, %v2348_v35  ;;  %v2351_v39 = vpop.f32.mrb[14].mxu1  ;;  %v2974_v22 = vadd.f32 %v2282_v21, %v2281_v19  ;;  %v2984_v35 = vld [vmem:[%s2888_s25 + $0x68] sm:$0xff] }
 0x11f   : > { %v2352_v40 = vpop.f32.mrb[15].mxu1 }
 0x120   : > { %v2353_v42 = vadd.f32 %v2352_v40, %v2351_v39  ;;  %2487 = vrot.lane.b32.xlu0 %v2486_v36, %s2733_s26 }
 0x122   : > { %v2491_v48 = vpack.i.bf16 %v2353_v42, %v2350_v38  ;;  %v2284_v29 = vpop.f32.mrb[12].mxu0  ;;  %v2526_v42 = vpack.i.bf16 %v2984_v35, %v2981_v34 }
 0x123   : > { %v2285_v31 = vpop.f32.mrb[13].mxu0 }
 0x124   : > { %v2354_v51 = vpop.f32.mrb[16].mxu1  ;;  %2492 = vrot.lane.b32.xlu1 %v2491_v48, %s2734_s19  ;;  %v2986_v36 = vadd.f32 %v2285_v31, %v2284_v29  ;;  %v2287_v37 = vpop.f32.mrb[14].mxu0 }
 0x125   : > { %v2355_v53 = vpop.f32.mrb[17].mxu1  ;;  %v2288_v39 = vpop.f32.mrb[15].mxu0 }
 0x126   : > { %v2356_v54 = vadd.f32 %v2355_v53, %v2354_v51  ;;  %v2357_v55 = vpop.f32.mrb[18].mxu1  ;;  %v2988_v40 = vadd.f32 %v2288_v39, %v2287_v37  ;;  %v2463_v29 = vpop.permute.xlu1 %2462 }
 0x127   : > { %v2358_v56 = vpop.f32.mrb[19].mxu1  ;;  %v2465_v31 = vunpack.i.h.bf16 %v2463_v29  ;;  %v2464_v37 = vunpack.i.l.bf16 %v2463_v29 }
 0x128   : > { %v2359_v58 = vadd.f32 %v2358_v56, %v2357_v55  ;;  %2497 = vrot.lane.b32.xlu1 %v2496_v52, %s2733_s26  ;;  %v2998_v55 = vld [vmem:[%s2888_s25 + $0x70] sm:$0xff]  ;;  %v3001_v56 = vld [vmem:[%s2888_s25 + $0x78] sm:$0xff] }
 0x129   : > { %v2536_v5 = vpack.i.bf16 %v3001_v56, %v2998_v55 }
 0x12a   : > { %v2501_v2 = vpack.i.bf16 %v2359_v58, %v2356_v54  ;;  %v2290_v51 = vpop.f32.mrb[16].mxu0  ;;  %v2627_v54 = vld [vmem:[%s3417_s7] sm:$0xff]  }
 0x12b   : > { %v2291_v53 = vpop.f32.mrb[17].mxu0  ;;  %2430 = vmatprep.subr.bf16.mxu1 %v2627_v54 }
 0x12c   : > { %v2360_v7 = vpop.f32.mrb[20].mxu1  ;;  %2502 = vrot.lane.b32.xlu0 %v2501_v2, %s2734_s19  ;;  %v3003_v57 = vadd.f32 %v2291_v53, %v2290_v51  ;;  %v2293_v58 = vpop.f32.mrb[18].mxu0  ;;  %2431 = vmatpush3.bf16.msra.mxu1 %v2627_v54 }
 0x12d   : > { %v2361_v9 = vpop.f32.mrb[21].mxu1  ;;  %v2294_v63 = vpop.f32.mrb[19].mxu0 }
 0x12e   : > { %v2362_v10 = vadd.f32 %v2361_v9, %v2360_v7  ;;  %v2363_v11 = vpop.f32.mrb[22].mxu1  ;;  %v3005_v2 = vadd.f32 %v2294_v63, %v2293_v58 }
 0x12f   : > { %v2364_v12 = vpop.f32.mrb[23].mxu1 }
 0x130   : > { %v2365_v14 = vadd.f32 %v2364_v12, %v2363_v11  ;;  %2507 = vrot.lane.b32.xlu0 %v2506_v8, %s2733_s26 }
 0x132   : > { %v2511_v20 = vpack.i.bf16 %v2365_v14, %v2362_v10  ;;  %v2296_v7 = vpop.f32.mrb[20].mxu0 }
 0x133   : > { %v2297_v8 = vpop.f32.mrb[21].mxu0 }
 0x134   : > { %v2366_v23 = vpop.f32.mrb[24].mxu1  ;;  %2512 = vrot.lane.b32.xlu1 %v2511_v20, %s2734_s19  ;;  %v3011_v9 = vadd.f32 %v2297_v8, %v2296_v7  ;;  %v2299_v10 = vpop.f32.mrb[22].mxu0 }
 0x135   : > { %v2367_v25 = vpop.f32.mrb[25].mxu1  ;;  %v2300_v11 = vpop.f32.mrb[23].mxu0 }
 0x136   : > { %v2368_v26 = vadd.f32 %v2367_v25, %v2366_v23  ;;  %v2369_v27 = vpop.f32.mrb[26].mxu1  ;;  %v3013_v12 = vadd.f32 %v2300_v11, %v2299_v10 }
 0x137   : > { %v2370_v28 = vpop.f32.mrb[27].mxu1 }
 0x138   : > { %v2371_v30 = vadd.f32 %v2370_v28, %v2369_v27  ;;  %2517 = vrot.lane.b32.xlu1 %v2516_v24, %s2733_s26 }
 0x13a   : > { %v2521_v38 = vpack.i.bf16 %v2371_v30, %v2368_v26  ;;  %v2302_v13 = vpop.f32.mrb[24].mxu0 }
 0x13b   : > { %v2303_v14 = vpop.f32.mrb[25].mxu0 }
 0x13c   : > { %v2372_v41 = vpop.f32.mrb[28].mxu1  ;;  %2522 = vrot.lane.b32.xlu0 %v2521_v38, %s2734_s19  ;;  %v3015_v15 = vadd.f32 %v2303_v14, %v2302_v13  ;;  %v2305_v19 = vpop.f32.mrb[26].mxu0 }
 0x13d   : > { %v2373_v43 = vpop.f32.mrb[29].mxu1  ;;  %v2306_v20 = vpop.f32.mrb[27].mxu0 }
 0x13e   : > { %v2374_v47 = vadd.f32 %v2373_v43, %v2372_v41  ;;  %v2375_v48 = vpop.f32.mrb[30].mxu1  ;;  %v3017_v21 = vadd.f32 %v2306_v20, %v2305_v19 }
 0x13f   : > { %v2376_v49 = vpop.f32.mrb[31].mxu1 }
 0x140   : > { %v2377_v52 = vadd.f32 %v2376_v49, %v2375_v48  ;;  %2527 = vrot.lane.b32.xlu0 %v2526_v42, %s2733_s26  ;;  %v2468_v49 = vpop.permute.xlu1 %2467 }
 0x141   : > { %v2469_v53 = vunpack.i.l.bf16 %v2468_v49 }
 0x142   : > { %v2531_v59 = vpack.i.bf16 %v2377_v52, %v2374_v47  ;;  %v2308_v23 = vpop.f32.mrb[28].mxu0  ;;  %v2470_v52 = vunpack.i.h.bf16 %v2468_v49 }
 0x143   : > { %v2309_v24 = vpop.f32.mrb[29].mxu0 }
 0x144   : > { %2532 = vrot.lane.b32.xlu1 %v2531_v59, %s2734_s19  ;;  %v3019_v25 = vadd.f32 %v2309_v24, %v2308_v23  ;;  %v2311_v26 = vpop.f32.mrb[30].mxu0 }
 0x145   : > { %v2312_v27 = vpop.f32.mrb[31].mxu0 }
 0x146   : > { %v3021_v28 = vadd.f32 %v2312_v27, %v2311_v26 }
 0x148   : > { %2537 = vrot.lane.b32.xlu1 %v2536_v5, %s2733_s26 }
 0x17e   : > { %v2473_v30 = vpop.permute.xlu0 %2472 }
 0x17f   : > { %v2475_v38 = vunpack.i.h.bf16 %v2473_v30  ;;  %v2474_v39 = vunpack.i.l.bf16 %v2473_v30 }
 0x181   : > { %v1191_v41 = vsel %vm1190_vm0, %v2944_v46, %v2474_v39  ;;  %v1192_v42 = vsel %vm1190_vm0, %v2946_v50, %v2475_v38 }
 0x182   : > { %v1208_v43 = vsel %vm1207_vm1, %v1191_v41, %v2464_v37  ;;  %v1209_v47 = vsel %vm1207_vm1, %v1192_v42, %v2465_v31 }
 0x183   : > { %v1224_v48 = vpack.c.bf16 %v1209_v47, %v1208_v43 }
 0x185   : > { %2414 = vmatprep.mubr.msk.bf16.mxu0 %vm1287_vm2, %v1224_v48 }
 0x186   : > { %v2478_v51 = vpop.permute.xlu0 %2477 }
 0x187   : > { %v2480_v54 = vunpack.i.h.bf16 %v2478_v51  ;;  %v2479_v58 = vunpack.i.l.bf16 %v2478_v51 }
 0x189   : > { %v1193_v46 = vsel %vm1190_vm0, %v2958_v62, %v2479_v58  ;;  %v1194_v50 = vsel %vm1190_vm0, %v2960_v6, %v2480_v54 }
 0x18a   : > { %v1210_v59 = vsel %vm1207_vm1, %v1193_v46, %v2469_v53  ;;  %v1211_v63 = vsel %vm1207_vm1, %v1194_v50, %v2470_v52 }
 0x18b   : > { %v1225_v5 = vpack.c.bf16 %v1211_v63, %v1210_v59 }
 0x18d   : > { %2415 = vmatmul.mubr.msk.bf16.vlgmr.msra.gmra.mrb[32].mxu0 %vm1287_vm2, %v1225_v5 }
 0x18e   : > { %v2483_v7 = vpop.permute.xlu0 %2482 }
 0x18f   : > { %v2485_v8 = vunpack.i.h.bf16 %v2483_v7  ;;  %v2484_v10 = vunpack.i.l.bf16 %v2483_v7 }
 0x191   : > { %v1195_v19 = vsel %vm1190_vm0, %v2972_v18, %v2484_v10  ;;  %v1196_v62 = vsel %vm1190_vm0, %v2974_v22, %v2485_v8 }
 0x192   : > { %v2488_v11 = vpop.permute.xlu0 %2487 }
 0x193   : > { %v2490_v13 = vunpack.i.h.bf16 %v2488_v11  ;;  %v2489_v14 = vunpack.i.l.bf16 %v2488_v11 }
 0x195   : > { %v1212_v6 = vsel %vm1207_vm1, %v1195_v19, %v2489_v14  ;;  %v1213_v20 = vsel %vm1207_vm1, %v1196_v62, %v2490_v13 }
 0x196   : > { %v1226_v23 = vpack.c.bf16 %v1213_v20, %v1212_v6  ;;  %v2493_v24 = vpop.permute.xlu1 %2492 }
 0x197   : > { %v2495_v26 = vunpack.i.h.bf16 %v2493_v24  ;;  %v2494_v27 = vunpack.i.l.bf16 %v2493_v24 }
 0x198   : > { %2418 = vmatprep.mubr.msk.bf16.mxu0 %vm1287_vm2, %v1226_v23 }
 0x199   : > { %v1197_v37 = vsel %vm1190_vm0, %v2986_v36, %v2494_v27  ;;  %v1198_v18 = vsel %vm1190_vm0, %v2988_v40, %v2495_v26 }
 0x19a   : > { %v2498_v29 = vpop.permute.xlu1 %2497 }
 0x19b   : > { %v2500_v30 = vunpack.i.h.bf16 %v2498_v29  ;;  %v2499_v31 = vunpack.i.l.bf16 %v2498_v29 }
 0x19d   : > { %v1214_v22 = vsel %vm1207_vm1, %v1197_v37, %v2499_v31  ;;  %v1215_v38 = vsel %vm1207_vm1, %v1198_v18, %v2500_v30 }
 0x19e   : > { %v1227_v39 = vpack.c.bf16 %v1215_v38, %v1214_v22  ;;  %v2503_v41 = vpop.permute.xlu0 %2502  ;;  %v2628_v38 = vld [vmem:[%s3417_s7 + $0x8] sm:$0xff]  }
 0x19f   : > { %v2505_v42 = vunpack.i.h.bf16 %v2503_v41  ;;  %v2504_v43 = vunpack.i.l.bf16 %v2503_v41  ;;  %2432 = vmatprep.subr.bf16.mxu1 %v2628_v38 }
 0x1a0   : > { %2419 = vmatmul.mubr.msk.bf16.gmra.mrb[36].mxu0 %vm1287_vm2, %v1227_v39  ;;  %2433 = vmatpush3.bf16.msra.mxu1 %v2628_v38 }
 0x1a1   : > { %v1199_v51 = vsel %vm1190_vm0, %v3003_v57, %v2504_v43  ;;  %v1200_v36 = vsel %vm1190_vm0, %v3005_v2, %v2505_v42 }
 0x1a2   : > { %v2508_v47 = vpop.permute.xlu0 %2507 }
 0x1a3   : > { %v2510_v48 = vunpack.i.h.bf16 %v2508_v47  ;;  %v2509_v49 = vunpack.i.l.bf16 %v2508_v47 }
 0x1a5   : > { %v1216_v40 = vsel %vm1207_vm1, %v1199_v51, %v2509_v49  ;;  %v1217_v52 = vsel %vm1207_vm1, %v1200_v36, %v2510_v48 }
 0x1a6   : > { %v1228_v53 = vpack.c.bf16 %v1217_v52, %v1216_v40  ;;  %v2513_v54 = vpop.permute.xlu1 %2512 }
 0x1a7   : > { %v2515_v58 = vunpack.i.h.bf16 %v2513_v54  ;;  %v2514_v46 = vunpack.i.l.bf16 %v2513_v54 }
 0x1a8   : > { %2422 = vmatprep.mubr.msk.bf16.mxu0 %vm1287_vm2, %v1228_v53 }
 0x1a9   : > { %v1201_v5 = vsel %vm1190_vm0, %v3011_v9, %v2514_v46  ;;  %v1202_v57 = vsel %vm1190_vm0, %v3013_v12, %v2515_v58 }
 0x1aa   : > { %v2518_v50 = vpop.permute.xlu1 %2517 }
 0x1ab   : > { %v2520_v59 = vunpack.i.h.bf16 %v2518_v50  ;;  %v2519_v63 = vunpack.i.l.bf16 %v2518_v50 }
 0x1ad   : > { %v1218_v2 = vsel %vm1207_vm1, %v1201_v5, %v2519_v63  ;;  %v1219_v7 = vsel %vm1207_vm1, %v1202_v57, %v2520_v59 }
 0x1ae   : > { %v1229_v8 = vpack.c.bf16 %v1219_v7, %v1218_v2  ;;  %v2523_v10 = vpop.permute.xlu0 %2522 }
 0x1af   : > { %v2525_v11 = vunpack.i.h.bf16 %v2523_v10  ;;  %v2524_v13 = vunpack.i.l.bf16 %v2523_v10 }
 0x1b0   : > { %2423 = vmatmul.mubr.msk.bf16.gmra.mrb[40].mxu0 %vm1287_vm2, %v1229_v8 }
 0x1b1   : > { %v1203_v6 = vsel %vm1190_vm0, %v3015_v15, %v2524_v13  ;;  %v1204_v9 = vsel %vm1190_vm0, %v3017_v21, %v2525_v11 }
 0x1b2   : > { %v2528_v14 = vpop.permute.xlu0 %2527 }
 0x1b3   : > { %v2530_v19 = vunpack.i.h.bf16 %v2528_v14  ;;  %v2529_v62 = vunpack.i.l.bf16 %v2528_v14 }
 0x1b5   : > { %v1220_v12 = vsel %vm1207_vm1, %v1203_v6, %v2529_v62  ;;  %v1221_v20 = vsel %vm1207_vm1, %v1204_v9, %v2530_v19 }
 0x1b6   : > { %v1230_v23 = vpack.c.bf16 %v1221_v20, %v1220_v12  ;;  %v2533_v24 = vpop.permute.xlu1 %2532 }
 0x1b7   : > { %v2535_v26 = vunpack.i.h.bf16 %v2533_v24  ;;  %v2534_v27 = vunpack.i.l.bf16 %v2533_v24 }
 0x1b8   : > { %2426 = vmatprep.mubr.msk.bf16.mxu0 %vm1287_vm2, %v1230_v23 }
 0x1b9   : > { %v1205_v37 = vsel %vm1190_vm0, %v3019_v25, %v2534_v27  ;;  %v1206_v15 = vsel %vm1190_vm0, %v3021_v28, %v2535_v26  ;;  %v3085_v25 = vld [vmem:[%s3416_s6] ss:$0 sm:$0xff] }
 0x1ba   : > { %v2538_v29 = vpop.permute.xlu1 %2537 }
 0x1bb   : > { %v2540_v30 = vunpack.i.h.bf16 %v2538_v29  ;;  %v2539_v31 = vunpack.i.l.bf16 %v2538_v29 }
 0x1bd   : > { %v1222_v21 = vsel %vm1207_vm1, %v1205_v37, %v2539_v31  ;;  %v1223_v18 = vsel %vm1207_vm1, %v1206_v15, %v2540_v30 }
 0x1be   : > { %v1231_v22 = vpack.c.bf16 %v1223_v18, %v1222_v21 }
 0x1c0   : > { %2427 = vmatmul.mubr.msk.bf16.gmra.mrb[44].mxu0 %vm1287_vm2, %v1231_v22 }
 0x260   : > { %v2416_v39 = vpop.f32.mrb[32].mxu0 }
 0x261   : > { %v3088_v28 = vadd.f32 %v2416_v39, %v3085_v25  ;;  %v1346_v41 = vpop.f32.mrb[33].mxu0 }
 0x262   : > { %v3091_v42 = vadd.f32 %v3085_v25, %v1346_v41  ;;  %v2417_v43 = vpop.f32.mrb[34].mxu0 }
 0x263   : > { %v2222_v47 = vmul.f32 -1.442695, %v3088_v28  ;;  %v3095_v48 = vadd.f32 %v2417_v43, %v3085_v25  ;;  %v1349_v49 = vpop.f32.mrb[35].mxu0 }
 0x264   : > { %v2220_v51 = vmul.f32 -1.442695, %v3091_v42  ;;  %v3099_v36 = vadd.f32 %v3085_v25, %v1349_v49 }
 0x265   : > { %2629 = vpow2.f32 %v2222_v47  ;;  %v2223_v40 = vmul.f32 -1.442695, %v3095_v48 }
 0x266   : > { %2631 = vpow2.f32 %v2220_v51  ;;  %v2221_v52 = vmul.f32 -1.442695, %v3099_v36 }
 0x267   : > { %2633 = vpow2.f32 %v2223_v40 }
 0x268   : > { %2635 = vpow2.f32 %v2221_v52 }
 0x26f   : > { %v2630_v53 = vpop.eup %2629 }
 0x270   : > { %v2632_v54 = vpop.eup %2631  ;;  %v1459_v58 = vadd.f32 1.0, %v2630_v53 }
 0x271   : > { %v2634_v46 = vpop.eup %2633  ;;  %v1457_v50 = vadd.f32 1.0, %v2632_v54 }
 0x272   : > { %v2636_v59 = vpop.eup %2635  ;;  %2637 = vrcp.f32 %v1459_v58  ;;  %v1460_v63 = vadd.f32 1.0, %v2634_v46 }
 0x273   : > { %2639 = vrcp.f32 %v1457_v50  ;;  %v1458_v5 = vadd.f32 1.0, %v2636_v59  ;;  %v2420_v57 = vpop.f32.mrb[36].mxu0 }
 0x274   : > { %2641 = vrcp.f32 %v1460_v63  ;;  %v3104_v2 = vadd.f32 %v2420_v57, %v3085_v25  ;;  %v1362_v7 = vpop.f32.mrb[37].mxu0 }
 0x275   : > { %2643 = vrcp.f32 %v1458_v5  ;;  %v3107_v8 = vadd.f32 %v3085_v25, %v1362_v7  ;;  %v2421_v10 = vpop.f32.mrb[38].mxu0 }
 0x276   : > { %v2226_v11 = vmul.f32 -1.442695, %v3104_v2  ;;  %v3111_v13 = vadd.f32 %v2421_v10, %v3085_v25  ;;  %v1365_v14 = vpop.f32.mrb[39].mxu0 }
 0x277   : > { %v2224_v19 = vmul.f32 -1.442695, %v3107_v8  ;;  %v3115_v62 = vadd.f32 %v3085_v25, %v1365_v14 }
 0x278   : > { %2645 = vpow2.f32 %v2226_v11  ;;  %v2227_v6 = vmul.f32 -1.442695, %v3111_v13 }
 0x279   : > { %2647 = vpow2.f32 %v2224_v19  ;;  %v2225_v9 = vmul.f32 -1.442695, %v3115_v62 }
 0x27a   : > { %2649 = vpow2.f32 %v2227_v6 }
 0x27b   : > { %2651 = vpow2.f32 %v2225_v9 }
 0x27c   : > { %v3119_v12 = vpop.eup %2637 }
 0x27d   : > { %v3121_v20 = vpop.eup %2639  ;;  %v1507_v30 = vmul.f32 %v3119_v12, %v2900_v3 }
 0x27e   : > { %v3123_v23 = vpop.eup %2641  ;;  %v1505_v27 = vmul.f32 %v3121_v20, %v2891_v0 }
 0x27f   : > { %v3125_v24 = vpop.eup %2643  ;;  %v1508_v26 = vmul.f32 %v3123_v23, %v2903_v4 }
 0x280   : > { %v1506_v29 = vmul.f32 %v3125_v24, %v2894_v1 }
 0x281   : > { %v1522_v22 = vpack.c.bf16 %v1508_v26, %v1507_v30 }
 0x282   : > { %v2646_v31 = vpop.eup %2645  ;;  %v1521_v37 = vpack.c.bf16 %v1506_v29, %v1505_v27 }
 0x283   : > { %v2648_v15 = vpop.eup %2647  ;;  %v1463_v21 = vadd.f32 1.0, %v2646_v31  ;;  %v2424_v18 = vpop.f32.mrb[40].mxu0 }
 0x284   : > { %v2650_v38 = vpop.eup %2649  ;;  %v1461_v39 = vadd.f32 1.0, %v2648_v15  ;;  %v3136_v41 = vadd.f32 %v2424_v18, %v3085_v25  ;;  %v1378_v43 = vpop.f32.mrb[41].mxu0  ;;  %2434 = vmatprep.mubr.msk.bf16.mxu1 %vm1190_vm0, %v1521_v37 }
 0x285   : > { %v2652_v47 = vpop.eup %2651  ;;  %2653 = vrcp.f32 %v1463_v21  ;;  %v1464_v49 = vadd.f32 1.0, %v2650_v38  ;;  %v3140_v51 = vadd.f32 %v3085_v25, %v1378_v43  ;;  %v2425_v40 = vpop.f32.mrb[42].mxu0  ;;  %2435 = vmatmul.mubr.msk.bf16.vlgmr.msra.gmra.mrb[32].mxu1 %vm1190_vm0, %v1522_v22 }
 0x286   : > { %2655 = vrcp.f32 %v1461_v39  ;;  %v1462_v52 = vadd.f32 1.0, %v2652_v47  ;;  %v2230_v53 = vmul.f32 -1.442695, %v3136_v41  ;;  %v3145_v54 = vadd.f32 %v2425_v40, %v3085_v25  ;;  %v1381_v58 = vpop.f32.mrb[43].mxu0 }
 0x287   : > { %2657 = vrcp.f32 %v1464_v49  ;;  %v2228_v46 = vmul.f32 -1.442695, %v3140_v51  ;;  %v3149_v50 = vadd.f32 %v3085_v25, %v1381_v58 }
 0x288   : > { %2659 = vrcp.f32 %v1462_v52  ;;  %v2231_v59 = vmul.f32 -1.442695, %v3145_v54 }
 0x289   : > { %2661 = vpow2.f32 %v2230_v53  ;;  %v2229_v63 = vmul.f32 -1.442695, %v3149_v50 }
 0x28a   : > { %2663 = vpow2.f32 %v2228_v46 }
 0x28b   : > { %2665 = vpow2.f32 %v2231_v59 }
 0x28c   : > { %2667 = vpow2.f32 %v2229_v63 }
 0x28f   : > { %v3153_v5 = vpop.eup %2653 }
 0x290   : > { %v3155_v57 = vpop.eup %2655  ;;  %v1511_v26 = vmul.f32 %v3153_v5, %v2939_v44 }
 0x291   : > { %v3157_v7 = vpop.eup %2657  ;;  %v1509_v6 = vmul.f32 %v3155_v57, %v2929_v32 }
 0x292   : > { %v3159_v10 = vpop.eup %2659  ;;  %v1512_v11 = vmul.f32 %v3157_v7, %v2942_v45 }
 0x293   : > { %v2662_v14 = vpop.eup %2661  ;;  %v2428_v19 = vpop.f32.mrb[44].mxu0  ;;  %v1510_v9 = vmul.f32 %v3159_v10, %v2932_v33 }
 0x294   : > { %v2664_v27 = vpop.eup %2663  ;;  %v1467_v29 = vadd.f32 1.0, %v2662_v14  ;;  %v3170_v30 = vadd.f32 %v2428_v19, %v3085_v25  ;;  %v1394_v31 = vpop.f32.mrb[45].mxu0  ;;  %v1524_v38 = vpack.c.bf16 %v1512_v11, %v1511_v26 }
 0x295   : > { %v2666_v37 = vpop.eup %2665  ;;  %v1465_v15 = vadd.f32 1.0, %v2664_v27  ;;  %v3173_v21 = vadd.f32 %v3085_v25, %v1394_v31  ;;  %v2429_v18 = vpop.f32.mrb[46].mxu0  ;;  %v1523_v22 = vpack.c.bf16 %v1510_v9, %v1509_v6 }
 0x296   : > { %v2668_v39 = vpop.eup %2667  ;;  %2669 = vrcp.f32 %v1467_v29  ;;  %v1468_v43 = vadd.f32 1.0, %v2666_v37  ;;  %v2234_v47 = vmul.f32 -1.442695, %v3170_v30  ;;  %v3177_v49 = vadd.f32 %v2429_v18, %v3085_v25  ;;  %v1397_v40 = vpop.f32.mrb[47].mxu0 }
 0x297   : > { %2671 = vrcp.f32 %v1465_v15  ;;  %v1466_v52 = vadd.f32 1.0, %v2668_v39  ;;  %v2232_v53 = vmul.f32 -1.442695, %v3173_v21  ;;  %v3181_v58 = vadd.f32 %v3085_v25, %v1397_v40  ;;  %2438 = vmatprep.mubr.msk.bf16.mxu1 %vm1190_vm0, %v1523_v22 }
 0x298   : > { %2673 = vrcp.f32 %v1468_v43  ;;  %v2235_v46 = vmul.f32 -1.442695, %v3177_v49  ;;  %2439 = vmatmul.mubr.msk.bf16.gmra.mrb[36].mxu1 %vm1190_vm0, %v1524_v38 }
 0x299   : > { %2675 = vrcp.f32 %v1466_v52  ;;  %v2233_v59 = vmul.f32 -1.442695, %v3181_v58 }
 0x29a   : > { %2677 = vpow2.f32 %v2234_v47 }
 0x29b   : > { %2679 = vpow2.f32 %v2232_v53 }
 0x29c   : > { %2681 = vpow2.f32 %v2235_v46 }
 0x29d   : > { %2683 = vpow2.f32 %v2233_v59 }
 0x2a0   : > { %v3187_v63 = vpop.eup %2669 }
 0x2a1   : > { %v3189_v11 = vpop.eup %2671  ;;  %v1515_v31 = vmul.f32 %v3187_v63, %v2967_v16 }
 0x2a2   : > { %v3191_v25 = vpop.eup %2673  ;;  %v1513_v9 = vmul.f32 %v3189_v11, %v2953_v60 }
 0x2a3   : > { %v3193_v14 = vpop.eup %2675  ;;  %v1516_v19 = vmul.f32 %v3191_v25, %v2970_v17 }
 0x2a4   : > { %v2678_v6 = vpop.eup %2677  ;;  %v1514_v26 = vmul.f32 %v3193_v14, %v2956_v61 }
 0x2a5   : > { %v2680_v27 = vpop.eup %2679  ;;  %v1471_v29 = vadd.f32 1.0, %v2678_v6  ;;  %v1526_v39 = vpack.c.bf16 %v1516_v19, %v1515_v31 }
 0x2a6   : > { %v2682_v37 = vpop.eup %2681  ;;  %v1469_v15 = vadd.f32 1.0, %v2680_v27  ;;  %v1525_v18 = vpack.c.bf16 %v1514_v26, %v1513_v9 }
 0x2a7   : > { %v2684_v22 = vpop.eup %2683  ;;  %2685 = vrcp.f32 %v1471_v29  ;;  %v1472_v38 = vadd.f32 1.0, %v2682_v37 }
 0x2a8   : > { %2687 = vrcp.f32 %v1469_v15  ;;  %v1470_v43 = vadd.f32 1.0, %v2684_v22  ;;  %2442 = vmatprep.mubr.msk.bf16.mxu1 %vm1190_vm0, %v1525_v18 }
 0x2a9   : > { %2689 = vrcp.f32 %v1472_v38  ;;  %2443 = vmatmul.mubr.msk.bf16.gmra.mrb[40].mxu1 %vm1190_vm0, %v1526_v39 }
 0x2aa   : > { %2691 = vrcp.f32 %v1470_v43 }
 0x2b1   : > { %v3205_v47 = vpop.eup %2685 }
 0x2b2   : > { %v3207_v40 = vpop.eup %2687  ;;  %v1519_v6 = vmul.f32 %v3205_v47, %v2998_v55 }
 0x2b3   : > { %v3209_v52 = vpop.eup %2689  ;;  %v1517_v59 = vmul.f32 %v3207_v40, %v2981_v34 }
 0x2b4   : > { %v3211_v53 = vpop.eup %2691  ;;  %v1520_v46 = vmul.f32 %v3209_v52, %v3001_v56 }
 0x2b5   : > { %v1518_v19 = vmul.f32 %v3211_v53, %v2984_v35 }
 0x2b6   : > { %v1528_v26 = vpack.c.bf16 %v1520_v46, %v1519_v6 }
 0x2b7   : > { %v1527_v9 = vpack.c.bf16 %v1518_v19, %v1517_v59 }
 0x2b9   : > { %2446 = vmatprep.mubr.msk.bf16.mxu1 %vm1190_vm0, %v1527_v9 }
 0x2ba   : > { %2447 = vmatmul.mubr.msk.bf16.gmra.mrb[44].mxu1 %vm1190_vm0, %v1528_v26 }
 0x358   : > { %v2436_v27 = vpop.f32.mrb[32].mxu1 }
 0x359   : > { %1686 = vrot.lane.b32.xlu0 %v2436_v27, %s2733_s26  ;;  %v1603_v29 = vpop.f32.mrb[33].mxu1 }
 0x35a   : > { %v2437_v31 = vpop.f32.mrb[34].mxu1 }
 0x35b   : > { %1688 = vrot.lane.b32.xlu1 %v2437_v31, %s2733_s26  ;;  %v1606_v37 = vpop.f32.mrb[35].mxu1 }
 0x35d   : > { %1682 = vrot.lane.b32.xlu0 %v1603_v29, %s2733_s26 }
 0x35f   : > { %1684 = vrot.lane.b32.xlu1 %v1606_v37, %s2733_s26 }
 0x36b   : > { %v2440_v15 = vpop.f32.mrb[36].mxu1 }
 0x36c   : > { %1694 = vrot.lane.b32.xlu0 %v2440_v15, %s2733_s26  ;;  %v1619_v18 = vpop.f32.mrb[37].mxu1 }
 0x36d   : > { %v2441_v22 = vpop.f32.mrb[38].mxu1 }
 0x36e   : > { %1696 = vrot.lane.b32.xlu1 %v2441_v22, %s2733_s26  ;;  %v1622_v38 = vpop.f32.mrb[39].mxu1 }
 0x370   : > { %1690 = vrot.lane.b32.xlu0 %v1619_v18, %s2733_s26 }
 0x372   : > { %1692 = vrot.lane.b32.xlu1 %v1622_v38, %s2733_s26 }
 0x37c   : > { %v2444_v39 = vpop.f32.mrb[40].mxu1 }
 0x37d   : > { %1702 = vrot.lane.b32.xlu0 %v2444_v39, %s2733_s26  ;;  %v1635_v43 = vpop.f32.mrb[41].mxu1 }
 0x37e   : > { %v2445_v46 = vpop.f32.mrb[42].mxu1 }
 0x37f   : > { %1704 = vrot.lane.b32.xlu1 %v2445_v46, %s2733_s26  ;;  %v1638_v59 = vpop.f32.mrb[43].mxu1 }
 0x381   : > { %1698 = vrot.lane.b32.xlu0 %v1635_v43, %s2733_s26 }
 0x383   : > { %1700 = vrot.lane.b32.xlu1 %v1638_v59, %s2733_s26 }
 0x38d   : > { %v2448_v19 = vpop.f32.mrb[44].mxu1 }
 0x38e   : > { %v1651_v6 = vpop.f32.mrb[45].mxu1 }
 0x38f   : > { %1706 = vrot.lane.b32.xlu0 %v1651_v6, %s2733_s26  ;;  %v2449_v9 = vpop.f32.mrb[46].mxu1 }
 0x390   : > { %v1654_v26 = vpop.f32.mrb[47].mxu1 }
 0x391   : > { %1708 = vrot.lane.b32.xlu1 %v1654_v26, %s2733_s26 }
 0x393   : > { %1710 = vrot.lane.b32.xlu0 %v2448_v19, %s2733_s26 }
 0x395   : > { %1712 = vrot.lane.b32.xlu1 %v2449_v9, %s2733_s26  ;;  %s2735_s26 = smov 96  }
 0x397   : > { %1778 = vrot.lane.b32.xlu0 %v2891_v0, %s2734_s19 }
 0x399   : > { %1780 = vrot.lane.b32.xlu1 %v2894_v1, %s2734_s19 }
 0x39b   : > { %1782 = vrot.lane.b32.xlu0 %v2900_v3, %s2734_s19 }
 0x39d   : > { %1784 = vrot.lane.b32.xlu1 %v2903_v4, %s2734_s19 }
 0x39f   : > { %1786 = vrot.lane.b32.xlu0 %v2929_v32, %s2734_s19 }
 0x3a1   : > { %1788 = vrot.lane.b32.xlu1 %v2932_v33, %s2734_s19 }
 0x3a3   : > { %1790 = vrot.lane.b32.xlu0 %v2939_v44, %s2734_s19 }
 0x3a5   : > { %1792 = vrot.lane.b32.xlu1 %v2942_v45, %s2734_s19 }
 0x3a7   : > { %1794 = vrot.lane.b32.xlu0 %v2953_v60, %s2734_s19 }
 0x3a9   : > { %1796 = vrot.lane.b32.xlu1 %v2956_v61, %s2734_s19 }
 0x3ab   : > { %1798 = vrot.lane.b32.xlu0 %v2967_v16, %s2734_s19 }
 0x3ad   : > { %1800 = vrot.lane.b32.xlu1 %v2970_v17, %s2734_s19 }
 0x3af   : > { %1802 = vrot.lane.b32.xlu0 %v2981_v34, %s2734_s19 }
 0x3b1   : > { %1804 = vrot.lane.b32.xlu1 %v2984_v35, %s2734_s19 }
 0x3b3   : > { %1806 = vrot.lane.b32.xlu0 %v2998_v55, %s2734_s19 }
 0x3b5   : > { %1808 = vrot.lane.b32.xlu1 %v3001_v56, %s2734_s19 }
 0x3cb   : > { %v1687_v0 = vpop.permute.xlu0 %1686 }
 0x3cc   : > { %v1732_v1 = vadd.f32 %v1687_v0, %v3088_v28 }
 0x3cd   : > { %v1689_v3 = vpop.permute.xlu1 %1688 }
 0x3ce   : > { %2693 = vtanh.f32 %v1732_v1  ;;  %v1733_v4 = vadd.f32 %v1689_v3, %v3095_v48 }
 0x3cf   : > { %v1683_v32 = vpop.permute.xlu0 %1682 }
 0x3d0   : > { %2695 = vtanh.f32 %v1733_v4  ;;  %v1730_v33 = vadd.f32 %v1683_v32, %v3091_v42 }
 0x3d1   : > { %v1685_v44 = vpop.permute.xlu1 %1684 }
 0x3d2   : > { %2697 = vtanh.f32 %v1730_v33  ;;  %v1731_v45 = vadd.f32 %v1685_v44, %v3099_v36 }
 0x3d4   : > { %2699 = vtanh.f32 %v1731_v45 }
 0x3d8   : > { %v2694_v60 = vpop.eup %2693 }
 0x3d9   : > { %1862 = vrot.lane.b32.xlu0 %v2694_v60, %s2735_s26 }
 0x3da   : > { %v2696_v61 = vpop.eup %2695 }
 0x3db   : > { %1864 = vrot.lane.b32.xlu1 %v2696_v61, %s2735_s26 }
 0x3dc   : > { %v2698_v16 = vpop.eup %2697 }
 0x3dd   : > { %1858 = vrot.lane.b32.xlu0 %v2698_v16, %s2735_s26 }
 0x3de   : > { %v2700_v17 = vpop.eup %2699  ;;  %v1695_v34 = vpop.permute.xlu0 %1694 }
 0x3df   : > { %v1736_v35 = vadd.f32 %v1695_v34, %v3104_v2  ;;  %1860 = vrot.lane.b32.xlu1 %v2700_v17, %s2735_s26 }
 0x3e0   : > { %v1697_v55 = vpop.permute.xlu1 %1696 }
 0x3e1   : > { %2701 = vtanh.f32 %v1736_v35  ;;  %v1737_v56 = vadd.f32 %v1697_v55, %v3111_v13 }
 0x3e2   : > { %v1691_v28 = vpop.permute.xlu0 %1690 }
 0x3e3   : > { %2703 = vtanh.f32 %v1737_v56  ;;  %v1734_v42 = vadd.f32 %v1691_v28, %v3107_v8  ;;  %v1764_v28 = vsub.f32 1.0, %v3119_v12 }
 0x3e4   : > { %v1693_v48 = vpop.permute.xlu1 %1692 }
 0x3e5   : > { %2705 = vtanh.f32 %v1734_v42  ;;  %v1735_v36 = vadd.f32 %v1693_v48, %v3115_v62 }
 0x3e7   : > { %2707 = vtanh.f32 %v1735_v36  ;;  %v1765_v36 = vsub.f32 1.0, %v3123_v23 }
 0x3eb   : > { %v2702_v27 = vpop.eup %2701 }
 0x3ec   : > { %1870 = vrot.lane.b32.xlu0 %v2702_v27, %s2735_s26 }
 0x3ed   : > { %v2704_v29 = vpop.eup %2703 }
 0x3ee   : > { %1872 = vrot.lane.b32.xlu1 %v2704_v29, %s2735_s26 }
 0x3ef   : > { %v2706_v2 = vpop.eup %2705  ;;  %v1703_v31 = vpop.permute.xlu0 %1702 }
 0x3f0   : > { %v1740_v37 = vadd.f32 %v1703_v31, %v3136_v41  ;;  %1866 = vrot.lane.b32.xlu0 %v2706_v2, %s2735_s26  ;;  %v1762_v2 = vsub.f32 1.0, %v3121_v20 }
 0x3f1   : > { %v2708_v13 = vpop.eup %2707  ;;  %v1705_v15 = vpop.permute.xlu1 %1704 }
 0x3f2   : > { %2709 = vtanh.f32 %v1740_v37  ;;  %v1741_v8 = vadd.f32 %v1705_v15, %v3145_v54  ;;  %1868 = vrot.lane.b32.xlu1 %v2708_v13, %s2735_s26 }
 0x3f3   : > { %v1699_v62 = vpop.permute.xlu0 %1698 }
 0x3f4   : > { %2711 = vtanh.f32 %v1741_v8  ;;  %v1738_v18 = vadd.f32 %v1699_v62, %v3140_v51  ;;  %v1763_v62 = vsub.f32 1.0, %v3125_v24 }
 0x3f5   : > { %v1701_v22 = vpop.permute.xlu1 %1700 }
 0x3f6   : > { %2713 = vtanh.f32 %v1738_v18  ;;  %v1739_v38 = vadd.f32 %v1701_v22, %v3149_v50 }
 0x3f8   : > { %2715 = vtanh.f32 %v1739_v38 }
 0x3fc   : > { %v2710_v39 = vpop.eup %2709 }
 0x3fd   : > { %1878 = vrot.lane.b32.xlu0 %v2710_v39, %s2735_s26 }
 0x3fe   : > { %v2712_v41 = vpop.eup %2711 }
 0x3ff   : > { %1880 = vrot.lane.b32.xlu1 %v2712_v41, %s2735_s26 }
 0x400   : > { %v2714_v43 = vpop.eup %2713 }
 0x401   : > { %v1707_v46 = vpop.permute.xlu0 %1706  ;;  %1874 = vrot.lane.b32.xlu0 %v2714_v43, %s2735_s26 }
 0x402   : > { %v2716_v54 = vpop.eup %2715  ;;  %v1742_v59 = vadd.f32 %v1707_v46, %v3173_v21 }
 0x403   : > { %v1709_v19 = vpop.permute.xlu1 %1708  ;;  %1876 = vrot.lane.b32.xlu1 %v2716_v54, %s2735_s26 }
 0x404   : > { %2717 = vtanh.f32 %v1742_v59  ;;  %v1743_v51 = vadd.f32 %v1709_v19, %v3181_v58 }
 0x405   : > { %v1711_v50 = vpop.permute.xlu0 %1710 }
 0x406   : > { %2719 = vtanh.f32 %v1743_v51  ;;  %v1744_v6 = vadd.f32 %v1711_v50, %v3170_v30  ;;  %v1766_v51 = vsub.f32 1.0, %v3155_v57 }
 0x407   : > { %v1713_v9 = vpop.permute.xlu1 %1712 }
 0x408   : > { %2721 = vtanh.f32 %v1744_v6  ;;  %v1745_v26 = vadd.f32 %v1713_v9, %v3177_v49 }
 0x409   : > { %v1779_v58 = vpop.permute.xlu0 %1778 }
 0x40a   : > { %2723 = vtanh.f32 %v1745_v26  ;;  %v1826_v8 = vmul.f32 %v1779_v58, %v1762_v2 }
 0x40b   : > { %v1781_v4 = vpop.permute.xlu1 %1780 }
 0x40c   : > { %v1827_v39 = vmul.f32 %v1781_v4, %v1763_v62 }
 0x40d   : > { %v1783_v30 = vpop.permute.xlu0 %1782 }
 0x40e   : > { %v2718_v0 = vpop.eup %2717  ;;  %v1828_v48 = vmul.f32 %v1783_v30, %v1764_v28 }
 0x40f   : > { %1882 = vrot.lane.b32.xlu0 %v2718_v0, %s2735_s26  ;;  %v1785_v32 = vpop.permute.xlu1 %1784  ;;  %v1767_v0 = vsub.f32 1.0, %v3159_v10 }
 0x410   : > { %v2720_v1 = vpop.eup %2719  ;;  %v1829_v31 = vmul.f32 %v1785_v32, %v1765_v36 }
 0x411   : > { %1884 = vrot.lane.b32.xlu1 %v2720_v1, %s2735_s26  ;;  %v1787_v33 = vpop.permute.xlu0 %1786 }
 0x412   : > { %v2722_v21 = vpop.eup %2721  ;;  %v1830_v26 = vmul.f32 %v1787_v33, %v1766_v51 }
 0x413   : > { %1886 = vrot.lane.b32.xlu0 %v2722_v21, %s2735_s26  ;;  %v1789_v44 = vpop.permute.xlu1 %1788 }
 0x414   : > { %v2724_v3 = vpop.eup %2723  ;;  %v1831_v58 = vmul.f32 %v1789_v44, %v1767_v0  ;;  %v1770_v44 = vsub.f32 1.0, %v3189_v11 }
 0x415   : > { %1888 = vrot.lane.b32.xlu1 %v2724_v3, %s2735_s26  ;;  %v1791_v49 = vpop.permute.xlu0 %1790 }
 0x417   : > { %v1793_v45 = vpop.permute.xlu1 %1792 }
 0x419   : > { %v3303_v60 = vpop.permute.xlu0 %1794 }
 0x41a   : > { %v1834_v36 = vmul.f32 %v3303_v60, %v1770_v44 }
 0x41b   : > { %v3305_v61 = vpop.permute.xlu1 %1796 }
 0x41d   : > { %v1799_v16 = vpop.permute.xlu0 %1798 }
 0x41f   : > { %v1801_v17 = vpop.permute.xlu1 %1800 }
 0x421   : > { %v3307_v34 = vpop.permute.xlu0 %1802 }
 0x423   : > { %v3309_v35 = vpop.permute.xlu1 %1804 }
 0x425   : > { %v3311_v55 = vpop.permute.xlu0 %1806 }
 0x427   : > { %v3313_v56 = vpop.permute.xlu1 %1808 }
 0x44b   : > { %v1863_v42 = vpop.permute.xlu0 %1862 }
 0x44c   : > { %v1908_v27 = vmul.f32 %v3119_v12, %v1863_v42 }
 0x44d   : > { %v1865_v29 = vpop.permute.xlu1 %1864 }
 0x44e   : > { %v1924_v37 = vadd.f32 %v1908_v27, %v1828_v48  ;;  %v1909_v13 = vmul.f32 %v3123_v23, %v1865_v29  ;;  %v1768_v23 = vsub.f32 1.0, %v3153_v5  ;;  %v1771_v27 = vsub.f32 1.0, %v3193_v14 }
 0x44f   : > { %v1859_v15 = vpop.permute.xlu0 %1858 }
 0x450   : > { %v1925_v18 = vadd.f32 %v1909_v13, %v1829_v31  ;;  %v1906_v22 = vmul.f32 %v3121_v20, %v1859_v15  ;;  %1958 = vrot.lane.b32.xlu0 %v1924_v37, %s2735_s26  ;;  %v1832_v54 = vmul.f32 %v1791_v49, %v1768_v23  ;;  %v1769_v20 = vsub.f32 1.0, %v3157_v7 }
 0x451   : > { %v1861_v38 = vpop.permute.xlu1 %1860  ;;  %v1775_v13 = vsub.f32 1.0, %v3211_v53 }
 0x452   : > { %v1922_v41 = vadd.f32 %v1906_v22, %v1826_v8  ;;  %v1907_v12 = vmul.f32 %v3125_v24, %v1861_v38  ;;  %1960 = vrot.lane.b32.xlu1 %v1925_v18, %s2735_s26  ;;  %v1833_v50 = vmul.f32 %v1793_v45, %v1769_v20 }
 0x453   : > { %v1839_v8 = vmul.f32 %v3309_v35, %v1775_v13 }
 0x454   : > { %v1923_v43 = vadd.f32 %v1907_v12, %v1827_v39  ;;  %1954 = vrot.lane.b32.xlu0 %v1922_v41, %s2735_s26  ;;  %v1777_v39 = vsub.f32 1.0, %v3209_v52 }
 0x456   : > { %1956 = vrot.lane.b32.xlu1 %v1923_v43, %s2735_s26  ;;  %v1841_v12 = vmul.f32 %v3313_v56, %v1777_v39 }
 0x45e   : > { %v1871_v46 = vpop.permute.xlu0 %1870 }
 0x45f   : > { %v1912_v59 = vmul.f32 %v3153_v5, %v1871_v46 }
 0x460   : > { %v1873_v19 = vpop.permute.xlu1 %1872 }
 0x461   : > { %v1928_v24 = vadd.f32 %v1912_v59, %v1832_v54  ;;  %v1913_v6 = vmul.f32 %v3157_v7, %v1873_v19  ;;  %v1772_v7 = vsub.f32 1.0, %v3187_v63 }
 0x462   : > { %v1867_v9 = vpop.permute.xlu0 %1866 }
 0x463   : > { %v1929_v1 = vadd.f32 %v1913_v6, %v1833_v50  ;;  %v1910_v21 = vmul.f32 %v3155_v57, %v1867_v9  ;;  %1966 = vrot.lane.b32.xlu0 %v1928_v24, %s2735_s26  ;;  %v1836_v33 = vmul.f32 %v1799_v16, %v1772_v7  ;;  %v1773_v57 = vsub.f32 1.0, %v3191_v25 }
 0x464   : > { %v1869_v3 = vpop.permute.xlu1 %1868 }
 0x465   : > { %v1926_v4 = vadd.f32 %v1910_v21, %v1830_v26  ;;  %v1911_v5 = vmul.f32 %v3159_v10, %v1869_v3  ;;  %1968 = vrot.lane.b32.xlu1 %v1929_v1, %s2735_s26  ;;  %v1837_v28 = vmul.f32 %v1801_v17, %v1773_v57 }
 0x467   : > { %v1927_v30 = vadd.f32 %v1911_v5, %v1831_v58  ;;  %1962 = vrot.lane.b32.xlu0 %v1926_v4, %s2735_s26 }
 0x469   : > { %1964 = vrot.lane.b32.xlu1 %v1927_v30, %s2735_s26 }
 0x46f   : > { %v1879_v32 = vpop.permute.xlu0 %1878 }
 0x470   : > { %v1916_v49 = vmul.f32 %v3187_v63, %v1879_v32  ;;  %v1835_v63 = vmul.f32 %v3305_v61, %v1771_v27 }
 0x471   : > { %v1881_v45 = vpop.permute.xlu1 %1880 }
 0x472   : > { %v1932_v10 = vadd.f32 %v1916_v49, %v1836_v33  ;;  %v1917_v42 = vmul.f32 %v3191_v25, %v1881_v45  ;;  %v1774_v25 = vsub.f32 1.0, %v3207_v40 }
 0x473   : > { %v1875_v48 = vpop.permute.xlu0 %1874 }
 0x474   : > { %v1933_v29 = vadd.f32 %v1917_v42, %v1837_v28  ;;  %v1914_v2 = vmul.f32 %v3189_v11, %v1875_v48  ;;  %1974 = vrot.lane.b32.xlu0 %v1932_v10, %s2735_s26  ;;  %v1838_v11 = vmul.f32 %v3307_v34, %v1774_v25 }
 0x475   : > { %v1877_v16 = vpop.permute.xlu1 %1876 }
 0x476   : > { %v1930_v31 = vadd.f32 %v1914_v2, %v1834_v36  ;;  %v1915_v37 = vmul.f32 %v3193_v14, %v1877_v16  ;;  %1976 = vrot.lane.b32.xlu1 %v1933_v29, %s2735_s26  ;;  %v1776_v14 = vsub.f32 1.0, %v3205_v47 }
 0x478   : > { %v1931_v17 = vadd.f32 %v1915_v37, %v1835_v63  ;;  %1970 = vrot.lane.b32.xlu0 %v1930_v31, %s2735_s26  ;;  %v1840_v38 = vmul.f32 %v3311_v55, %v1776_v14 }
 0x47a   : > { %1972 = vrot.lane.b32.xlu1 %v1931_v17, %s2735_s26 }
 0x481   : > { %v1883_v60 = vpop.permute.xlu0 %1882 }
 0x482   : > { %v1918_v15 = vmul.f32 %v3207_v40, %v1883_v60 }
 0x483   : > { %v1885_v61 = vpop.permute.xlu1 %1884 }
 0x484   : > { %v1934_v62 = vadd.f32 %v1918_v15, %v1838_v11  ;;  %v1919_v18 = vmul.f32 %v3211_v53, %v1885_v61 }
 0x485   : > { %v1887_v22 = vpop.permute.xlu0 %1886 }
 0x486   : > { %v1935_v41 = vadd.f32 %v1919_v18, %v1839_v8  ;;  %v1920_v34 = vmul.f32 %v3205_v47, %v1887_v22  ;;  %1978 = vrot.lane.b32.xlu0 %v1934_v62, %s2735_s26 }
 0x487   : > { %v1889_v40 = vpop.permute.xlu1 %1888 }
 0x488   : > { %v1936_v35 = vadd.f32 %v1920_v34, %v1840_v38  ;;  %v1921_v43 = vmul.f32 %v3209_v52, %v1889_v40  ;;  %1980 = vrot.lane.b32.xlu1 %v1935_v41, %s2735_s26 }
 0x48a   : > { %v1937_v23 = vadd.f32 %v1921_v43, %v1841_v12  ;;  %1982 = vrot.lane.b32.xlu0 %v1936_v35, %s2735_s26 }
 0x48c   : > { %1984 = vrot.lane.b32.xlu1 %v1937_v23, %s2735_s26 }
 0x4c2   : > { %v1959_v47 = vpop.permute.xlu0 %1958 }
 0x4c3   : > { %2004 = vst.msk [vmem:[%s3373_s30 + $0x10] sm:$0xff] %vm1190_vm0, %v1959_v47 }
 0x4c4   : > { %v1961_v52 = vpop.permute.xlu1 %1960 }
 0x4c5   : > { %2005 = vst.msk [vmem:[%s3373_s30 + $0x18] sm:$0xff] %vm1190_vm0, %v1961_v52 }
 0x4c6   : > { %v1955_v53 = vpop.permute.xlu0 %1954 }
 0x4c7   : > { %2002 = vst.msk [vmem:[%s3373_s30] sm:$0xff] %vm1190_vm0, %v1955_v53 }
 0x4c8   : > { %v1957_v55 = vpop.permute.xlu1 %1956 }
 0x4c9   : > { %2003 = vst.msk [vmem:[%s3373_s30 + $0x8] sm:$0xff] %vm1190_vm0, %v1957_v55 }
 0x4d5   : > { %v1967_v56 = vpop.permute.xlu0 %1966 }
 0x4d6   : > { %2008 = vst.msk [vmem:[%s3373_s30 + $0x30] sm:$0xff] %vm1190_vm0, %v1967_v56 }
 0x4d7   : > { %v1969_v46 = vpop.permute.xlu1 %1968 }
 0x4d8   : > { %2009 = vst.msk [vmem:[%s3373_s30 + $0x38] sm:$0xff] %vm1190_vm0, %v1969_v46 }
 0x4d9   : > { %v1963_v54 = vpop.permute.xlu0 %1962 }
 0x4da   : > { %2006 = vst.msk [vmem:[%s3373_s30 + $0x20] sm:$0xff] %vm1190_vm0, %v1963_v54 }
 0x4db   : > { %v1965_v20 = vpop.permute.xlu1 %1964 }
 0x4dc   : > { %2007 = vst.msk [vmem:[%s3373_s30 + $0x28] sm:$0xff] %vm1190_vm0, %v1965_v20 }
 0x4e6   : > { %v1975_v59 = vpop.permute.xlu0 %1974 }
 0x4e7   : > { %2012 = vst.msk [vmem:[%s3373_s30 + $0x50] sm:$0xff] %vm1190_vm0, %v1975_v59 }
 0x4e8   : > { %v1977_v19 = vpop.permute.xlu1 %1976 }
 0x4e9   : > { %2013 = vst.msk [vmem:[%s3373_s30 + $0x58] sm:$0xff] %vm1190_vm0, %v1977_v19 }
 0x4ea   : > { %v1971_v51 = vpop.permute.xlu0 %1970 }
 0x4eb   : > { %2010 = vst.msk [vmem:[%s3373_s30 + $0x40] sm:$0xff] %vm1190_vm0, %v1971_v51 }
 0x4ec   : > { %v1973_v50 = vpop.permute.xlu1 %1972 }
 0x4ed   : > { %2011 = vst.msk [vmem:[%s3373_s30 + $0x48] sm:$0xff] %vm1190_vm0, %v1973_v50 }
 0x4f8   : > { %v1979_v24 = vpop.permute.xlu0 %1978 }
 0x4f9   : > { %2014 = vst.msk [vmem:[%s3373_s30 + $0x60] sm:$0xff] %vm1190_vm0, %v1979_v24 }
 0x4fa   : > { %v1981_v6 = vpop.permute.xlu1 %1980 }
 0x4fb   : > { %2015 = vst.msk [vmem:[%s3373_s30 + $0x68] sm:$0xff] %vm1190_vm0, %v1981_v6 }
 0x4fc   : > { %v1983_v9 = vpop.permute.xlu0 %1982 }
 0x4fd   : > { %2016 = vst.msk [vmem:[%s3373_s30 + $0x70] sm:$0xff] %vm1190_vm0, %v1983_v9 }
 0x4fe   : > { %v1985_v26 = vpop.permute.xlu1 %1984 }
 0x4ff   : > { %2017 = vst.msk [vmem:[%s3373_s30 + $0x78] sm:$0xff] %vm1190_vm0, %v1985_v26 }
 0x500 PF: > { %s18_s27 = sadd.s32 1, %s2731_s27  }
 0x501   : > { %p15_p5 = scmp.ge.s32.totalorder %s18_s27, 4  }
 0x503   :  { %17 = sbr.rel (!%p15_p5) target bundleno = 1 (0x1), region = 94 }

</bundles_post_ra>
